<compile_context>
chip_gen: v5e
topology: v5e:2x2
jax: 0.10.0
libtpu: 0.0.40
codegen_flags: <defaults>
</compile_context>

<pallas_src>
import math
import jax
import jax.numpy as jnp
from jax.experimental import pallas as pl
from jax.experimental.pallas import tpu as pltpu  # noqa: F401  (TPU backend)

# ---- small BERT config (synthetic, mirrors Bert_Model at toy size) ----
B, S, H = 2, 8, 32          # batch, seq, hidden
NH, DH = 4, 8               # heads, head dim (NH * DH == H)
I = 64                      # intermediate (FFN) size
L = 2                       # number of encoder layers
VOCAB = 100
MAXPOS = 64
NTYPES = 2
CLASSES = 10
LN_EPS = 1e-12
T = B * S                   # total tokens


def _ln(x, g, b):
    m = jnp.mean(x, axis=-1, keepdims=True)
    v = jnp.mean(jnp.square(x - m), axis=-1, keepdims=True)
    return (x - m) * jax.lax.rsqrt(v + LN_EPS) * g + b


# ---------------- Fully fused BERT forward kernel (single invocation) ----------------
def bert_fused_kernel(emb_ref, mask_ref, embg_ref, embb_ref,
                      wqkv_ref, bqkv_ref, wo_ref, bo_ref,
                      ln1g_ref, ln1b_ref, w1_ref, b1_ref,
                      w2_ref, b2_ref, ln2g_ref, ln2b_ref,
                      poolw_ref, poolb_ref, fcw_ref, fcb_ref,
                      o_ref):
    mask = mask_ref[...]                                   # (NH*B, 1, S) f32, loaded once
    x = _ln(emb_ref[...], embg_ref[...], embb_ref[...])    # (T, H) f32 embedding LayerNorm

    def mm(v_f32, w_bf16, b_f32):                          # bf16 MXU inputs, f32 accumulate
        return jnp.dot(v_f32.astype(jnp.bfloat16), w_bf16,
                       preferred_element_type=jnp.float32) + b_f32

    def split_heads(t2):                                   # (T, H) -> (NH*B, S, DH)
        return jnp.concatenate(
            [t2[:, h * DH:(h + 1) * DH].reshape(B, S, DH) for h in range(NH)], axis=0)

    for l in range(L):                                     # fully unrolled (L is small)
        xb = x.astype(jnp.bfloat16)
        # --- QKV: leading-axis (3,H,H) weight layout -> no lane-axis qkv slicing ---
        q2 = jnp.dot(xb, wqkv_ref[l, 0], preferred_element_type=jnp.float32) + bqkv_ref[l, 0]
        k2 = jnp.dot(xb, wqkv_ref[l, 1], preferred_element_type=jnp.float32) + bqkv_ref[l, 1]
        v2 = jnp.dot(xb, wqkv_ref[l, 2], preferred_element_type=jnp.float32) + bqkv_ref[l, 2]
        qh, kh, vh = split_heads(q2), split_heads(k2), split_heads(v2)

        # --- batched-head attention: ONE score matmul / softmax / context matmul ---
        s = jnp.einsum('nqd,nkd->nqk', qh, kh,
                       preferred_element_type=jnp.float32) + mask          # (NH*B, S, S)
        s = s - jnp.max(s, axis=-1, keepdims=True)
        p = jnp.exp(s)
        p = p * pl.reciprocal(jnp.sum(p, axis=-1, keepdims=True), approx=True)
        ctx = jnp.einsum('nqk,nkd->nqd', p, vh,
                         preferred_element_type=jnp.float32)               # (NH*B, S, DH)

        # --- merge heads and do a single (T,H)@(H,H) output projection ---
        ctx2 = jnp.concatenate(
            [ctx[h * B:(h + 1) * B].reshape(T, DH) for h in range(NH)], axis=-1)  # (T, H)
        attn = mm(ctx2, wo_ref[l], bo_ref[l])

        # --- residual + LN1, FFN (GELU), residual + LN2 ---
        h1 = _ln(x + attn, ln1g_ref[l], ln1b_ref[l])
        # TODO(synk): HF BERT uses exact erf-GELU; tanh-approx GELU used here (EUP-friendly).
        ff = jax.nn.gelu(mm(h1, w1_ref[l], b1_ref[l]), approximate=True)
        x = _ln(h1 + mm(ff, w2_ref[l], b2_ref[l]), ln2g_ref[l], ln2b_ref[l])

    # --- pooler (tanh on [CLS]) + classifier head ---
    cls = x.reshape(B, S, H)[:, 0, :]                      # (B, H)
    pooled = jnp.tanh(mm(cls, poolw_ref[...], poolb_ref[...]))
    logits = mm(pooled, fcw_ref[...], fcb_ref[...])
    o_ref[...] = logits.astype(o_ref.dtype)


# ---------------- Parameters (deterministic synthetic init) ----------------
def init_params(key):
    ks = iter(jax.random.split(key, 32))

    def nrm(shape):
        return (0.02 * jax.random.normal(next(ks), shape)).astype(jnp.float32)

    scale = 1.0 / math.sqrt(DH)
    wq = nrm((L, H, H)) * scale            # fold attention scale into Wq
    wk = nrm((L, H, H))
    wv = nrm((L, H, H))
    wqkv = jnp.stack([wq, wk, wv], axis=1)                 # (L, 3, H, H)
    # biases are zero in this synthetic init; a nonzero bq would need scaling too.
    bqkv = jnp.zeros((L, 3, 1, H), jnp.float32)

    params = {
        'word_emb': nrm((VOCAB, H)),
        'pos_emb': nrm((MAXPOS, H)),
        'type_emb': nrm((NTYPES, H)),
        'emb_ln_g': jnp.ones((1, H), jnp.float32),
        'emb_ln_b': jnp.zeros((1, H), jnp.float32),
        'wqkv': wqkv.astype(jnp.bfloat16),                 # (L, 3, H, H)
        'bqkv': bqkv,                                      # (L, 3, 1, H)
        'wo': nrm((L, H, H)).astype(jnp.bfloat16),         # rows ordered (head, dh)
        'bo': jnp.zeros((L, 1, H), jnp.float32),
        'ln1_g': jnp.ones((L, 1, H), jnp.float32),
        'ln1_b': jnp.zeros((L, 1, H), jnp.float32),
        'w1': nrm((L, H, I)).astype(jnp.bfloat16),
        'b1': jnp.zeros((L, 1, I), jnp.float32),
        'w2': nrm((L, I, H)).astype(jnp.bfloat16),
        'b2': jnp.zeros((L, 1, H), jnp.float32),
        'ln2_g': jnp.ones((L, 1, H), jnp.float32),
        'ln2_b': jnp.zeros((L, 1, H), jnp.float32),
        'pool_w': nrm((H, H)).astype(jnp.bfloat16),
        'pool_b': jnp.zeros((1, H), jnp.float32),
        'fc_w': nrm((H, CLASSES)).astype(jnp.bfloat16),
        'fc_b': jnp.zeros((1, CLASSES), jnp.float32),
    }
    return params


# ---------------- Forward pass (mirrors Bert_Model.forward) ----------------
def bert_model_forward(params, input_ids, attention_mask, token_type_ids):
    seq = input_ids.shape[1]
    # embedding gathers + mask prep are glue (plain JAX); everything else is in the kernel
    emb = (params['word_emb'][input_ids]
           + params['pos_emb'][:seq][None, :, :]
           + params['type_emb'][token_type_ids]).astype(jnp.float32).reshape(T, H)
    add_mask = (1.0 - attention_mask.astype(jnp.float32))[:, None, :] * -10000.0  # (B,1,S)
    # broadcast ONCE to the batched-head layout used inside the kernel: (NH*B, 1, S)
    mask = jnp.broadcast_to(add_mask[None], (NH, B, 1, S)).reshape(NH * B, 1, S)

    args = (emb, mask,
            params['emb_ln_g'], params['emb_ln_b'],
            params['wqkv'], params['bqkv'], params['wo'], params['bo'],
            params['ln1_g'], params['ln1_b'], params['w1'], params['b1'],
            params['w2'], params['b2'], params['ln2_g'], params['ln2_b'],
            params['pool_w'], params['pool_b'], params['fc_w'], params['fc_b'])

    flops = L * (3 * 2 * T * H * H                  # Q/K/V projections
                 + 4 * B * NH * S * S * DH          # scores + context
                 + 2 * T * H * H                    # output projection
                 + 4 * T * H * I)                   # FFN
    flops += 2 * B * H * H + 2 * B * H * CLASSES    # pooler + classifier
    transcendentals = L * (B * NH * S * S + T * I) + B * H
    bytes_accessed = (sum(int(a.size) * a.dtype.itemsize for a in args)
                      + B * CLASSES * 4)

    # No grid: single invocation, whole arrays VMEM-resident (default BlockSpecs).
    return pl.pallas_call(
        bert_fused_kernel,
        out_shape=jax.ShapeDtypeStruct((B, CLASSES), jnp.float32),
        cost_estimate=pl.CostEstimate(flops=flops,
                                      transcendentals=transcendentals,
                                      bytes_accessed=bytes_accessed),
    )(*args)


if __name__ == "__main__":
    key = jax.random.PRNGKey(0)
    pkey, dkey = jax.random.split(key)
    params = init_params(pkey)

    input_ids = jax.random.randint(dkey, (B, S), 0, VOCAB, dtype=jnp.int32)
    attention_mask = jnp.ones((B, S), dtype=jnp.int32)
    token_type_ids = jnp.zeros((B, S), dtype=jnp.int32)

    logits = bert_model_forward(params, input_ids, attention_mask, token_type_ids)
    logits = jax.block_until_ready(logits)
    assert logits.shape == (B, CLASSES), logits.shape
    assert bool(jnp.all(jnp.isfinite(logits)))
    print("KERNEL_OK")
</pallas_src>

<mosaic_0001>
module attributes {stable_mosaic.version = 11 : i64} {
  func.func @bert_fused_kernel(%arg0: memref<16x32xf32, #tpu.memory_space<vmem>>, %arg1: memref<8x1x8xf32, #tpu.memory_space<vmem>>, %arg2: memref<1x32xf32, #tpu.memory_space<vmem>>, %arg3: memref<1x32xf32, #tpu.memory_space<vmem>>, %arg4: memref<2x3x32x32xbf16, #tpu.memory_space<vmem>>, %arg5: memref<2x3x1x32xf32, #tpu.memory_space<vmem>>, %arg6: memref<2x32x32xbf16, #tpu.memory_space<vmem>>, %arg7: memref<2x1x32xf32, #tpu.memory_space<vmem>>, %arg8: memref<2x1x32xf32, #tpu.memory_space<vmem>>, %arg9: memref<2x1x32xf32, #tpu.memory_space<vmem>>, %arg10: memref<2x32x64xbf16, #tpu.memory_space<vmem>>, %arg11: memref<2x1x64xf32, #tpu.memory_space<vmem>>, %arg12: memref<2x64x32xbf16, #tpu.memory_space<vmem>>, %arg13: memref<2x1x32xf32, #tpu.memory_space<vmem>>, %arg14: memref<2x1x32xf32, #tpu.memory_space<vmem>>, %arg15: memref<2x1x32xf32, #tpu.memory_space<vmem>>, %arg16: memref<32x32xbf16, #tpu.memory_space<vmem>>, %arg17: memref<1x32xf32, #tpu.memory_space<vmem>>, %arg18: memref<32x10xbf16, #tpu.memory_space<vmem>>, %arg19: memref<1x10xf32, #tpu.memory_space<vmem>>, %arg20: memref<2x10xf32, #tpu.memory_space<vmem>>) attributes {dimension_semantics = [], scalar_prefetch = 0 : i64, scratch_operands = 0 : i64, tpu.core_type = #tpu.core_type<tc>} {
    %c0 = arith.constant 0 : index
    %c0_0 = arith.constant 0 : index
    %c0_1 = arith.constant 0 : index
    %0 = vector.load %arg1[%c0, %c0_0, %c0_1] : memref<8x1x8xf32, #tpu.memory_space<vmem>>, vector<8x1x8xf32>
    %c0_2 = arith.constant 0 : index
    %c0_3 = arith.constant 0 : index
    %1 = vector.load %arg0[%c0_2, %c0_3] : memref<16x32xf32, #tpu.memory_space<vmem>>, vector<16x32xf32>
    %c0_4 = arith.constant 0 : index
    %c0_5 = arith.constant 0 : index
    %2 = vector.load %arg2[%c0_4, %c0_5] : memref<1x32xf32, #tpu.memory_space<vmem>>, vector<1x32xf32>
    %c0_6 = arith.constant 0 : index
    %c0_7 = arith.constant 0 : index
    %3 = vector.load %arg3[%c0_6, %c0_7] : memref<1x32xf32, #tpu.memory_space<vmem>>, vector<1x32xf32>
    %cst = arith.constant dense<0.000000e+00> : vector<16xf32>
    %4 = vector.multi_reduction <add>, %1, %cst [1] : vector<16x32xf32> to vector<16xf32>
    %5 = vector.shape_cast %4 : vector<16xf32> to vector<16x1xf32>
    %cst_8 = arith.constant 3.200000e+01 : f32
    %6 = vector.broadcast %cst_8 : f32 to vector<16x1xf32>
    %7 = arith.divf %5, %6 : vector<16x1xf32>
    %8 = vector.broadcast %7 : vector<16x1xf32> to vector<16x32xf32>
    %9 = arith.subf %1, %8 : vector<16x32xf32>
    %10 = arith.mulf %9, %9 : vector<16x32xf32>
    %cst_9 = arith.constant dense<0.000000e+00> : vector<16xf32>
    %11 = vector.multi_reduction <add>, %10, %cst_9 [1] : vector<16x32xf32> to vector<16xf32>
    %12 = vector.shape_cast %11 : vector<16xf32> to vector<16x1xf32>
    %cst_10 = arith.constant 3.200000e+01 : f32
    %13 = vector.broadcast %cst_10 : f32 to vector<16x1xf32>
    %14 = arith.divf %12, %13 : vector<16x1xf32>
    %15 = vector.broadcast %7 : vector<16x1xf32> to vector<16x32xf32>
    %16 = arith.subf %1, %15 : vector<16x32xf32>
    %cst_11 = arith.constant 9.99999996E-13 : f32
    %17 = vector.broadcast %cst_11 : f32 to vector<16x1xf32>
    %18 = arith.addf %14, %17 : vector<16x1xf32>
    %19 = math.rsqrt %18 : vector<16x1xf32>
    %20 = vector.broadcast %19 : vector<16x1xf32> to vector<16x32xf32>
    %21 = arith.mulf %16, %20 : vector<16x32xf32>
    %22 = vector.broadcast %2 : vector<1x32xf32> to vector<16x32xf32>
    %23 = arith.mulf %21, %22 : vector<16x32xf32>
    %24 = vector.broadcast %3 : vector<1x32xf32> to vector<16x32xf32>
    %25 = arith.addf %23, %24 : vector<16x32xf32>
    %26 = arith.truncf %25 : vector<16x32xf32> to vector<16x32xbf16>
    %c0_12 = arith.constant 0 : index
    %c0_13 = arith.constant 0 : index
    %c0_14 = arith.constant 0 : index
    %c0_15 = arith.constant 0 : index
    %27 = vector.load %arg4[%c0_12, %c0_13, %c0_14, %c0_15] : memref<2x3x32x32xbf16, #tpu.memory_space<vmem>>, vector<1x1x32x32xbf16>
    %28 = vector.shape_cast %27 : vector<1x1x32x32xbf16> to vector<32x32xbf16>
    %cst_16 = arith.constant dense<0.000000e+00> : vector<16x32xf32>
    %29 = tpu.matmul %26, %28, %cst_16 {dimension_numbers = #tpu.dot_dimension_numbers<[1], [0], [0], [1], [0, 0, 1, 1], [], []>} : vector<16x32xbf16>, vector<32x32xbf16>, vector<16x32xf32> -> vector<16x32xf32>
    %c0_17 = arith.constant 0 : index
    %c0_18 = arith.constant 0 : index
    %c0_19 = arith.constant 0 : index
    %c0_20 = arith.constant 0 : index
    %30 = vector.load %arg5[%c0_17, %c0_18, %c0_19, %c0_20] : memref<2x3x1x32xf32, #tpu.memory_space<vmem>>, vector<1x1x1x32xf32>
    %31 = vector.shape_cast %30 : vector<1x1x1x32xf32> to vector<1x32xf32>
    %32 = vector.broadcast %31 : vector<1x32xf32> to vector<16x32xf32>
    %33 = arith.addf %29, %32 : vector<16x32xf32>
    %c0_21 = arith.constant 0 : index
    %c1 = arith.constant 1 : index
    %c0_22 = arith.constant 0 : index
    %c0_23 = arith.constant 0 : index
    %34 = vector.load %arg4[%c0_21, %c1, %c0_22, %c0_23] : memref<2x3x32x32xbf16, #tpu.memory_space<vmem>>, vector<1x1x32x32xbf16>
    %35 = vector.shape_cast %34 : vector<1x1x32x32xbf16> to vector<32x32xbf16>
    %cst_24 = arith.constant dense<0.000000e+00> : vector<16x32xf32>
    %36 = tpu.matmul %26, %35, %cst_24 {dimension_numbers = #tpu.dot_dimension_numbers<[1], [0], [0], [1], [0, 0, 1, 1], [], []>} : vector<16x32xbf16>, vector<32x32xbf16>, vector<16x32xf32> -> vector<16x32xf32>
    %c0_25 = arith.constant 0 : index
    %c1_26 = arith.constant 1 : index
    %c0_27 = arith.constant 0 : index
    %c0_28 = arith.constant 0 : index
    %37 = vector.load %arg5[%c0_25, %c1_26, %c0_27, %c0_28] : memref<2x3x1x32xf32, #tpu.memory_space<vmem>>, vector<1x1x1x32xf32>
    %38 = vector.shape_cast %37 : vector<1x1x1x32xf32> to vector<1x32xf32>
    %39 = vector.broadcast %38 : vector<1x32xf32> to vector<16x32xf32>
    %40 = arith.addf %36, %39 : vector<16x32xf32>
    %c0_29 = arith.constant 0 : index
    %c2 = arith.constant 2 : index
    %c0_30 = arith.constant 0 : index
    %c0_31 = arith.constant 0 : index
    %41 = vector.load %arg4[%c0_29, %c2, %c0_30, %c0_31] : memref<2x3x32x32xbf16, #tpu.memory_space<vmem>>, vector<1x1x32x32xbf16>
    %42 = vector.shape_cast %41 : vector<1x1x32x32xbf16> to vector<32x32xbf16>
    %cst_32 = arith.constant dense<0.000000e+00> : vector<16x32xf32>
    %43 = tpu.matmul %26, %42, %cst_32 {dimension_numbers = #tpu.dot_dimension_numbers<[1], [0], [0], [1], [0, 0, 1, 1], [], []>} : vector<16x32xbf16>, vector<32x32xbf16>, vector<16x32xf32> -> vector<16x32xf32>
    %c0_33 = arith.constant 0 : index
    %c2_34 = arith.constant 2 : index
    %c0_35 = arith.constant 0 : index
    %c0_36 = arith.constant 0 : index
    %44 = vector.load %arg5[%c0_33, %c2_34, %c0_35, %c0_36] : memref<2x3x1x32xf32, #tpu.memory_space<vmem>>, vector<1x1x1x32xf32>
    %45 = vector.shape_cast %44 : vector<1x1x1x32xf32> to vector<1x32xf32>
    %46 = vector.broadcast %45 : vector<1x32xf32> to vector<16x32xf32>
    %47 = arith.addf %43, %46 : vector<16x32xf32>
    %48 = vector.extract_strided_slice %33 {offsets = [0, 0], sizes = [16, 8], strides = [1, 1]} : vector<16x32xf32> to vector<16x8xf32>
    %49 = vector.shape_cast %48 : vector<16x8xf32> to vector<2x8x8xf32>
    %50 = vector.extract_strided_slice %33 {offsets = [0, 8], sizes = [16, 8], strides = [1, 1]} : vector<16x32xf32> to vector<16x8xf32>
    %51 = vector.shape_cast %50 : vector<16x8xf32> to vector<2x8x8xf32>
    %52 = vector.extract_strided_slice %33 {offsets = [0, 16], sizes = [16, 8], strides = [1, 1]} : vector<16x32xf32> to vector<16x8xf32>
    %53 = vector.shape_cast %52 : vector<16x8xf32> to vector<2x8x8xf32>
    %54 = vector.extract_strided_slice %33 {offsets = [0, 24], sizes = [16, 8], strides = [1, 1]} : vector<16x32xf32> to vector<16x8xf32>
    %55 = vector.shape_cast %54 : vector<16x8xf32> to vector<2x8x8xf32>
    %56 = tpu.concatenate %49, %51, %53, %55 in 0 : vector<2x8x8xf32>, vector<2x8x8xf32>, vector<2x8x8xf32>, vector<2x8x8xf32> -> vector<8x8x8xf32>
    %57 = vector.extract_strided_slice %40 {offsets = [0, 0], sizes = [16, 8], strides = [1, 1]} : vector<16x32xf32> to vector<16x8xf32>
    %58 = vector.shape_cast %57 : vector<16x8xf32> to vector<2x8x8xf32>
    %59 = vector.extract_strided_slice %40 {offsets = [0, 8], sizes = [16, 8], strides = [1, 1]} : vector<16x32xf32> to vector<16x8xf32>
    %60 = vector.shape_cast %59 : vector<16x8xf32> to vector<2x8x8xf32>
    %61 = vector.extract_strided_slice %40 {offsets = [0, 16], sizes = [16, 8], strides = [1, 1]} : vector<16x32xf32> to vector<16x8xf32>
    %62 = vector.shape_cast %61 : vector<16x8xf32> to vector<2x8x8xf32>
    %63 = vector.extract_strided_slice %40 {offsets = [0, 24], sizes = [16, 8], strides = [1, 1]} : vector<16x32xf32> to vector<16x8xf32>
    %64 = vector.shape_cast %63 : vector<16x8xf32> to vector<2x8x8xf32>
    %65 = tpu.concatenate %58, %60, %62, %64 in 0 : vector<2x8x8xf32>, vector<2x8x8xf32>, vector<2x8x8xf32>, vector<2x8x8xf32> -> vector<8x8x8xf32>
    %66 = vector.extract_strided_slice %47 {offsets = [0, 0], sizes = [16, 8], strides = [1, 1]} : vector<16x32xf32> to vector<16x8xf32>
    %67 = vector.shape_cast %66 : vector<16x8xf32> to vector<2x8x8xf32>
    %68 = vector.extract_strided_slice %47 {offsets = [0, 8], sizes = [16, 8], strides = [1, 1]} : vector<16x32xf32> to vector<16x8xf32>
    %69 = vector.shape_cast %68 : vector<16x8xf32> to vector<2x8x8xf32>
    %70 = vector.extract_strided_slice %47 {offsets = [0, 16], sizes = [16, 8], strides = [1, 1]} : vector<16x32xf32> to vector<16x8xf32>
    %71 = vector.shape_cast %70 : vector<16x8xf32> to vector<2x8x8xf32>
    %72 = vector.extract_strided_slice %47 {offsets = [0, 24], sizes = [16, 8], strides = [1, 1]} : vector<16x32xf32> to vector<16x8xf32>
    %73 = vector.shape_cast %72 : vector<16x8xf32> to vector<2x8x8xf32>
    %74 = tpu.concatenate %67, %69, %71, %73 in 0 : vector<2x8x8xf32>, vector<2x8x8xf32>, vector<2x8x8xf32>, vector<2x8x8xf32> -> vector<8x8x8xf32>
    "tpu.trace_start"() <{level = 10 : i32, message = "nqd,nkd->nqk"}> : () -> ()
    %cst_37 = arith.constant dense<0.000000e+00> : vector<8x8x8xf32>
    %75 = tpu.matmul %56, %65, %cst_37 {dimension_numbers = #tpu.dot_dimension_numbers<[2], [2], [1], [1], [0, 0, 0, 1, 1, 1], [0], [0]>} : vector<8x8x8xf32>, vector<8x8x8xf32>, vector<8x8x8xf32> -> vector<8x8x8xf32>
    "tpu.trace_stop"() : () -> ()
    %76 = vector.broadcast %0 : vector<8x1x8xf32> to vector<8x8x8xf32>
    %77 = arith.addf %75, %76 : vector<8x8x8xf32>
    %cst_38 = arith.constant dense<0xFF800000> : vector<8x8xf32>
    %78 = vector.multi_reduction <maximumf>, %77, %cst_38 [2] : vector<8x8x8xf32> to vector<8x8xf32>
    %79 = vector.shape_cast %78 : vector<8x8xf32> to vector<8x8x1xf32>
    %80 = vector.broadcast %79 : vector<8x8x1xf32> to vector<8x8x8xf32>
    %81 = arith.subf %77, %80 : vector<8x8x8xf32>
    %82 = math.exp %81 : vector<8x8x8xf32>
    %cst_39 = arith.constant dense<0.000000e+00> : vector<8x8xf32>
    %83 = vector.multi_reduction <add>, %82, %cst_39 [2] : vector<8x8x8xf32> to vector<8x8xf32>
    %84 = vector.shape_cast %83 : vector<8x8xf32> to vector<8x8x1xf32>
    %85 = tpu.reciprocal %84 {approx = true} : vector<8x8x1xf32> -> vector<8x8x1xf32>
    %86 = vector.broadcast %85 : vector<8x8x1xf32> to vector<8x8x8xf32>
    %87 = arith.mulf %82, %86 : vector<8x8x8xf32>
    "tpu.trace_start"() <{level = 10 : i32, message = "nqk,nkd->nqd"}> : () -> ()
    %cst_40 = arith.constant dense<0.000000e+00> : vector<8x8x8xf32>
    %88 = tpu.matmul %87, %74, %cst_40 {dimension_numbers = #tpu.dot_dimension_numbers<[2], [1], [1], [2], [0, 0, 0, 1, 1, 2], [0], [0]>} : vector<8x8x8xf32>, vector<8x8x8xf32>, vector<8x8x8xf32> -> vector<8x8x8xf32>
    "tpu.trace_stop"() : () -> ()
    %89 = vector.extract_strided_slice %88 {offsets = [0, 0, 0], sizes = [2, 8, 8], strides = [1, 1, 1]} : vector<8x8x8xf32> to vector<2x8x8xf32>
    %90 = vector.shape_cast %89 : vector<2x8x8xf32> to vector<16x8xf32>
    %91 = vector.extract_strided_slice %88 {offsets = [2, 0, 0], sizes = [2, 8, 8], strides = [1, 1, 1]} : vector<8x8x8xf32> to vector<2x8x8xf32>
    %92 = vector.shape_cast %91 : vector<2x8x8xf32> to vector<16x8xf32>
    %93 = vector.extract_strided_slice %88 {offsets = [4, 0, 0], sizes = [2, 8, 8], strides = [1, 1, 1]} : vector<8x8x8xf32> to vector<2x8x8xf32>
    %94 = vector.shape_cast %93 : vector<2x8x8xf32> to vector<16x8xf32>
    %95 = vector.extract_strided_slice %88 {offsets = [6, 0, 0], sizes = [2, 8, 8], strides = [1, 1, 1]} : vector<8x8x8xf32> to vector<2x8x8xf32>
    %96 = vector.shape_cast %95 : vector<2x8x8xf32> to vector<16x8xf32>
    %97 = tpu.concatenate %90, %92, %94, %96 in 1 : vector<16x8xf32>, vector<16x8xf32>, vector<16x8xf32>, vector<16x8xf32> -> vector<16x32xf32>
    %c0_41 = arith.constant 0 : index
    %c0_42 = arith.constant 0 : index
    %c0_43 = arith.constant 0 : index
    %98 = vector.load %arg6[%c0_41, %c0_42, %c0_43] : memref<2x32x32xbf16, #tpu.memory_space<vmem>>, vector<1x32x32xbf16>
    %99 = vector.shape_cast %98 : vector<1x32x32xbf16> to vector<32x32xbf16>
    %c0_44 = arith.constant 0 : index
    %c0_45 = arith.constant 0 : index
    %c0_46 = arith.constant 0 : index
    %100 = vector.load %arg7[%c0_44, %c0_45, %c0_46] : memref<2x1x32xf32, #tpu.memory_space<vmem>>, vector<1x1x32xf32>
    %101 = vector.shape_cast %100 : vector<1x1x32xf32> to vector<1x32xf32>
    %102 = arith.truncf %97 : vector<16x32xf32> to vector<16x32xbf16>
    %cst_47 = arith.constant dense<0.000000e+00> : vector<16x32xf32>
    %103 = tpu.matmul %102, %99, %cst_47 {dimension_numbers = #tpu.dot_dimension_numbers<[1], [0], [0], [1], [0, 0, 1, 1], [], []>} : vector<16x32xbf16>, vector<32x32xbf16>, vector<16x32xf32> -> vector<16x32xf32>
    %104 = vector.broadcast %101 : vector<1x32xf32> to vector<16x32xf32>
    %105 = arith.addf %103, %104 : vector<16x32xf32>
    %106 = arith.addf %25, %105 : vector<16x32xf32>
    %c0_48 = arith.constant 0 : index
    %c0_49 = arith.constant 0 : index
    %c0_50 = arith.constant 0 : index
    %107 = vector.load %arg8[%c0_48, %c0_49, %c0_50] : memref<2x1x32xf32, #tpu.memory_space<vmem>>, vector<1x1x32xf32>
    %108 = vector.shape_cast %107 : vector<1x1x32xf32> to vector<1x32xf32>
    %c0_51 = arith.constant 0 : index
    %c0_52 = arith.constant 0 : index
    %c0_53 = arith.constant 0 : index
    %109 = vector.load %arg9[%c0_51, %c0_52, %c0_53] : memref<2x1x32xf32, #tpu.memory_space<vmem>>, vector<1x1x32xf32>
    %110 = vector.shape_cast %109 : vector<1x1x32xf32> to vector<1x32xf32>
    %cst_54 = arith.constant dense<0.000000e+00> : vector<16xf32>
    %111 = vector.multi_reduction <add>, %106, %cst_54 [1] : vector<16x32xf32> to vector<16xf32>
    %112 = vector.shape_cast %111 : vector<16xf32> to vector<16x1xf32>
    %cst_55 = arith.constant 3.200000e+01 : f32
    %113 = vector.broadcast %cst_55 : f32 to vector<16x1xf32>
    %114 = arith.divf %112, %113 : vector<16x1xf32>
    %115 = vector.broadcast %114 : vector<16x1xf32> to vector<16x32xf32>
    %116 = arith.subf %106, %115 : vector<16x32xf32>
    %117 = arith.mulf %116, %116 : vector<16x32xf32>
    %cst_56 = arith.constant dense<0.000000e+00> : vector<16xf32>
    %118 = vector.multi_reduction <add>, %117, %cst_56 [1] : vector<16x32xf32> to vector<16xf32>
    %119 = vector.shape_cast %118 : vector<16xf32> to vector<16x1xf32>
    %cst_57 = arith.constant 3.200000e+01 : f32
    %120 = vector.broadcast %cst_57 : f32 to vector<16x1xf32>
    %121 = arith.divf %119, %120 : vector<16x1xf32>
    %122 = vector.broadcast %114 : vector<16x1xf32> to vector<16x32xf32>
    %123 = arith.subf %106, %122 : vector<16x32xf32>
    %cst_58 = arith.constant 9.99999996E-13 : f32
    %124 = vector.broadcast %cst_58 : f32 to vector<16x1xf32>
    %125 = arith.addf %121, %124 : vector<16x1xf32>
    %126 = math.rsqrt %125 : vector<16x1xf32>
    %127 = vector.broadcast %126 : vector<16x1xf32> to vector<16x32xf32>
    %128 = arith.mulf %123, %127 : vector<16x32xf32>
    %129 = vector.broadcast %108 : vector<1x32xf32> to vector<16x32xf32>
    %130 = arith.mulf %128, %129 : vector<16x32xf32>
    %131 = vector.broadcast %110 : vector<1x32xf32> to vector<16x32xf32>
    %132 = arith.addf %130, %131 : vector<16x32xf32>
    %c0_59 = arith.constant 0 : index
    %c0_60 = arith.constant 0 : index
    %c0_61 = arith.constant 0 : index
    %133 = vector.load %arg10[%c0_59, %c0_60, %c0_61] : memref<2x32x64xbf16, #tpu.memory_space<vmem>>, vector<1x32x64xbf16>
    %134 = vector.shape_cast %133 : vector<1x32x64xbf16> to vector<32x64xbf16>
    %c0_62 = arith.constant 0 : index
    %c0_63 = arith.constant 0 : index
    %c0_64 = arith.constant 0 : index
    %135 = vector.load %arg11[%c0_62, %c0_63, %c0_64] : memref<2x1x64xf32, #tpu.memory_space<vmem>>, vector<1x1x64xf32>
    %136 = vector.shape_cast %135 : vector<1x1x64xf32> to vector<1x64xf32>
    %137 = arith.truncf %132 : vector<16x32xf32> to vector<16x32xbf16>
    %cst_65 = arith.constant dense<0.000000e+00> : vector<16x64xf32>
    %138 = tpu.matmul %137, %134, %cst_65 {dimension_numbers = #tpu.dot_dimension_numbers<[1], [0], [0], [1], [0, 0, 1, 1], [], []>} : vector<16x32xbf16>, vector<32x64xbf16>, vector<16x64xf32> -> vector<16x64xf32>
    %139 = vector.broadcast %136 : vector<1x64xf32> to vector<16x64xf32>
    %140 = arith.addf %138, %139 : vector<16x64xf32>
    %141 = arith.mulf %140, %140 : vector<16x64xf32>
    %142 = arith.mulf %140, %141 : vector<16x64xf32>
    %cst_66 = arith.constant 4.471500e-02 : f32
    %143 = vector.broadcast %cst_66 : f32 to vector<16x64xf32>
    %144 = arith.mulf %143, %142 : vector<16x64xf32>
    %145 = arith.addf %140, %144 : vector<16x64xf32>
    %cst_67 = arith.constant 0.797884583 : f32
    %146 = vector.broadcast %cst_67 : f32 to vector<16x64xf32>
    %147 = arith.mulf %146, %145 : vector<16x64xf32>
    %148 = math.tanh %147 : vector<16x64xf32>
    %cst_68 = arith.constant 1.000000e+00 : f32
    %149 = vector.broadcast %cst_68 : f32 to vector<16x64xf32>
    %150 = arith.addf %149, %148 : vector<16x64xf32>
    %cst_69 = arith.constant 5.000000e-01 : f32
    %151 = vector.broadcast %cst_69 : f32 to vector<16x64xf32>
    %152 = arith.mulf %151, %150 : vector<16x64xf32>
    %153 = arith.mulf %140, %152 : vector<16x64xf32>
    %c0_70 = arith.constant 0 : index
    %c0_71 = arith.constant 0 : index
    %c0_72 = arith.constant 0 : index
    %154 = vector.load %arg12[%c0_70, %c0_71, %c0_72] : memref<2x64x32xbf16, #tpu.memory_space<vmem>>, vector<1x64x32xbf16>
    %155 = vector.shape_cast %154 : vector<1x64x32xbf16> to vector<64x32xbf16>
    %c0_73 = arith.constant 0 : index
    %c0_74 = arith.constant 0 : index
    %c0_75 = arith.constant 0 : index
    %156 = vector.load %arg13[%c0_73, %c0_74, %c0_75] : memref<2x1x32xf32, #tpu.memory_space<vmem>>, vector<1x1x32xf32>
    %157 = vector.shape_cast %156 : vector<1x1x32xf32> to vector<1x32xf32>
    %158 = arith.truncf %153 : vector<16x64xf32> to vector<16x64xbf16>
    %cst_76 = arith.constant dense<0.000000e+00> : vector<16x32xf32>
    %159 = tpu.matmul %158, %155, %cst_76 {dimension_numbers = #tpu.dot_dimension_numbers<[1], [0], [0], [1], [0, 0, 1, 1], [], []>} : vector<16x64xbf16>, vector<64x32xbf16>, vector<16x32xf32> -> vector<16x32xf32>
    %160 = vector.broadcast %157 : vector<1x32xf32> to vector<16x32xf32>
    %161 = arith.addf %159, %160 : vector<16x32xf32>
    %162 = arith.addf %132, %161 : vector<16x32xf32>
    %c0_77 = arith.constant 0 : index
    %c0_78 = arith.constant 0 : index
    %c0_79 = arith.constant 0 : index
    %163 = vector.load %arg14[%c0_77, %c0_78, %c0_79] : memref<2x1x32xf32, #tpu.memory_space<vmem>>, vector<1x1x32xf32>
    %164 = vector.shape_cast %163 : vector<1x1x32xf32> to vector<1x32xf32>
    %c0_80 = arith.constant 0 : index
    %c0_81 = arith.constant 0 : index
    %c0_82 = arith.constant 0 : index
    %165 = vector.load %arg15[%c0_80, %c0_81, %c0_82] : memref<2x1x32xf32, #tpu.memory_space<vmem>>, vector<1x1x32xf32>
    %166 = vector.shape_cast %165 : vector<1x1x32xf32> to vector<1x32xf32>
    %cst_83 = arith.constant dense<0.000000e+00> : vector<16xf32>
    %167 = vector.multi_reduction <add>, %162, %cst_83 [1] : vector<16x32xf32> to vector<16xf32>
    %168 = vector.shape_cast %167 : vector<16xf32> to vector<16x1xf32>
    %cst_84 = arith.constant 3.200000e+01 : f32
    %169 = vector.broadcast %cst_84 : f32 to vector<16x1xf32>
    %170 = arith.divf %168, %169 : vector<16x1xf32>
    %171 = vector.broadcast %170 : vector<16x1xf32> to vector<16x32xf32>
    %172 = arith.subf %162, %171 : vector<16x32xf32>
    %173 = arith.mulf %172, %172 : vector<16x32xf32>
    %cst_85 = arith.constant dense<0.000000e+00> : vector<16xf32>
    %174 = vector.multi_reduction <add>, %173, %cst_85 [1] : vector<16x32xf32> to vector<16xf32>
    %175 = vector.shape_cast %174 : vector<16xf32> to vector<16x1xf32>
    %cst_86 = arith.constant 3.200000e+01 : f32
    %176 = vector.broadcast %cst_86 : f32 to vector<16x1xf32>
    %177 = arith.divf %175, %176 : vector<16x1xf32>
    %178 = vector.broadcast %170 : vector<16x1xf32> to vector<16x32xf32>
    %179 = arith.subf %162, %178 : vector<16x32xf32>
    %cst_87 = arith.constant 9.99999996E-13 : f32
    %180 = vector.broadcast %cst_87 : f32 to vector<16x1xf32>
    %181 = arith.addf %177, %180 : vector<16x1xf32>
    %182 = math.rsqrt %181 : vector<16x1xf32>
    %183 = vector.broadcast %182 : vector<16x1xf32> to vector<16x32xf32>
    %184 = arith.mulf %179, %183 : vector<16x32xf32>
    %185 = vector.broadcast %164 : vector<1x32xf32> to vector<16x32xf32>
    %186 = arith.mulf %184, %185 : vector<16x32xf32>
    %187 = vector.broadcast %166 : vector<1x32xf32> to vector<16x32xf32>
    %188 = arith.addf %186, %187 : vector<16x32xf32>
    %189 = arith.truncf %188 : vector<16x32xf32> to vector<16x32xbf16>
    %c1_88 = arith.constant 1 : index
    %c0_89 = arith.constant 0 : index
    %c0_90 = arith.constant 0 : index
    %c0_91 = arith.constant 0 : index
    %190 = vector.load %arg4[%c1_88, %c0_89, %c0_90, %c0_91] : memref<2x3x32x32xbf16, #tpu.memory_space<vmem>>, vector<1x1x32x32xbf16>
    %191 = vector.shape_cast %190 : vector<1x1x32x32xbf16> to vector<32x32xbf16>
    %cst_92 = arith.constant dense<0.000000e+00> : vector<16x32xf32>
    %192 = tpu.matmul %189, %191, %cst_92 {dimension_numbers = #tpu.dot_dimension_numbers<[1], [0], [0], [1], [0, 0, 1, 1], [], []>} : vector<16x32xbf16>, vector<32x32xbf16>, vector<16x32xf32> -> vector<16x32xf32>
    %c1_93 = arith.constant 1 : index
    %c0_94 = arith.constant 0 : index
    %c0_95 = arith.constant 0 : index
    %c0_96 = arith.constant 0 : index
    %193 = vector.load %arg5[%c1_93, %c0_94, %c0_95, %c0_96] : memref<2x3x1x32xf32, #tpu.memory_space<vmem>>, vector<1x1x1x32xf32>
    %194 = vector.shape_cast %193 : vector<1x1x1x32xf32> to vector<1x32xf32>
    %195 = vector.broadcast %194 : vector<1x32xf32> to vector<16x32xf32>
    %196 = arith.addf %192, %195 : vector<16x32xf32>
    %c1_97 = arith.constant 1 : index
    %c1_98 = arith.constant 1 : index
    %c0_99 = arith.constant 0 : index
    %c0_100 = arith.constant 0 : index
    %197 = vector.load %arg4[%c1_97, %c1_98, %c0_99, %c0_100] : memref<2x3x32x32xbf16, #tpu.memory_space<vmem>>, vector<1x1x32x32xbf16>
    %198 = vector.shape_cast %197 : vector<1x1x32x32xbf16> to vector<32x32xbf16>
    %cst_101 = arith.constant dense<0.000000e+00> : vector<16x32xf32>
    %199 = tpu.matmul %189, %198, %cst_101 {dimension_numbers = #tpu.dot_dimension_numbers<[1], [0], [0], [1], [0, 0, 1, 1], [], []>} : vector<16x32xbf16>, vector<32x32xbf16>, vector<16x32xf32> -> vector<16x32xf32>
    %c1_102 = arith.constant 1 : index
    %c1_103 = arith.constant 1 : index
    %c0_104 = arith.constant 0 : index
    %c0_105 = arith.constant 0 : index
    %200 = vector.load %arg5[%c1_102, %c1_103, %c0_104, %c0_105] : memref<2x3x1x32xf32, #tpu.memory_space<vmem>>, vector<1x1x1x32xf32>
    %201 = vector.shape_cast %200 : vector<1x1x1x32xf32> to vector<1x32xf32>
    %202 = vector.broadcast %201 : vector<1x32xf32> to vector<16x32xf32>
    %203 = arith.addf %199, %202 : vector<16x32xf32>
    %c1_106 = arith.constant 1 : index
    %c2_107 = arith.constant 2 : index
    %c0_108 = arith.constant 0 : index
    %c0_109 = arith.constant 0 : index
    %204 = vector.load %arg4[%c1_106, %c2_107, %c0_108, %c0_109] : memref<2x3x32x32xbf16, #tpu.memory_space<vmem>>, vector<1x1x32x32xbf16>
    %205 = vector.shape_cast %204 : vector<1x1x32x32xbf16> to vector<32x32xbf16>
    %cst_110 = arith.constant dense<0.000000e+00> : vector<16x32xf32>
    %206 = tpu.matmul %189, %205, %cst_110 {dimension_numbers = #tpu.dot_dimension_numbers<[1], [0], [0], [1], [0, 0, 1, 1], [], []>} : vector<16x32xbf16>, vector<32x32xbf16>, vector<16x32xf32> -> vector<16x32xf32>
    %c1_111 = arith.constant 1 : index
    %c2_112 = arith.constant 2 : index
    %c0_113 = arith.constant 0 : index
    %c0_114 = arith.constant 0 : index
    %207 = vector.load %arg5[%c1_111, %c2_112, %c0_113, %c0_114] : memref<2x3x1x32xf32, #tpu.memory_space<vmem>>, vector<1x1x1x32xf32>
    %208 = vector.shape_cast %207 : vector<1x1x1x32xf32> to vector<1x32xf32>
    %209 = vector.broadcast %208 : vector<1x32xf32> to vector<16x32xf32>
    %210 = arith.addf %206, %209 : vector<16x32xf32>
    %211 = vector.extract_strided_slice %196 {offsets = [0, 0], sizes = [16, 8], strides = [1, 1]} : vector<16x32xf32> to vector<16x8xf32>
    %212 = vector.shape_cast %211 : vector<16x8xf32> to vector<2x8x8xf32>
    %213 = vector.extract_strided_slice %196 {offsets = [0, 8], sizes = [16, 8], strides = [1, 1]} : vector<16x32xf32> to vector<16x8xf32>
    %214 = vector.shape_cast %213 : vector<16x8xf32> to vector<2x8x8xf32>
    %215 = vector.extract_strided_slice %196 {offsets = [0, 16], sizes = [16, 8], strides = [1, 1]} : vector<16x32xf32> to vector<16x8xf32>
    %216 = vector.shape_cast %215 : vector<16x8xf32> to vector<2x8x8xf32>
    %217 = vector.extract_strided_slice %196 {offsets = [0, 24], sizes = [16, 8], strides = [1, 1]} : vector<16x32xf32> to vector<16x8xf32>
    %218 = vector.shape_cast %217 : vector<16x8xf32> to vector<2x8x8xf32>
    %219 = tpu.concatenate %212, %214, %216, %218 in 0 : vector<2x8x8xf32>, vector<2x8x8xf32>, vector<2x8x8xf32>, vector<2x8x8xf32> -> vector<8x8x8xf32>
    %220 = vector.extract_strided_slice %203 {offsets = [0, 0], sizes = [16, 8], strides = [1, 1]} : vector<16x32xf32> to vector<16x8xf32>
    %221 = vector.shape_cast %220 : vector<16x8xf32> to vector<2x8x8xf32>
    %222 = vector.extract_strided_slice %203 {offsets = [0, 8], sizes = [16, 8], strides = [1, 1]} : vector<16x32xf32> to vector<16x8xf32>
    %223 = vector.shape_cast %222 : vector<16x8xf32> to vector<2x8x8xf32>
    %224 = vector.extract_strided_slice %203 {offsets = [0, 16], sizes = [16, 8], strides = [1, 1]} : vector<16x32xf32> to vector<16x8xf32>
    %225 = vector.shape_cast %224 : vector<16x8xf32> to vector<2x8x8xf32>
    %226 = vector.extract_strided_slice %203 {offsets = [0, 24], sizes = [16, 8], strides = [1, 1]} : vector<16x32xf32> to vector<16x8xf32>
    %227 = vector.shape_cast %226 : vector<16x8xf32> to vector<2x8x8xf32>
    %228 = tpu.concatenate %221, %223, %225, %227 in 0 : vector<2x8x8xf32>, vector<2x8x8xf32>, vector<2x8x8xf32>, vector<2x8x8xf32> -> vector<8x8x8xf32>
    %229 = vector.extract_strided_slice %210 {offsets = [0, 0], sizes = [16, 8], strides = [1, 1]} : vector<16x32xf32> to vector<16x8xf32>
    %230 = vector.shape_cast %229 : vector<16x8xf32> to vector<2x8x8xf32>
    %231 = vector.extract_strided_slice %210 {offsets = [0, 8], sizes = [16, 8], strides = [1, 1]} : vector<16x32xf32> to vector<16x8xf32>
    %232 = vector.shape_cast %231 : vector<16x8xf32> to vector<2x8x8xf32>
    %233 = vector.extract_strided_slice %210 {offsets = [0, 16], sizes = [16, 8], strides = [1, 1]} : vector<16x32xf32> to vector<16x8xf32>
    %234 = vector.shape_cast %233 : vector<16x8xf32> to vector<2x8x8xf32>
    %235 = vector.extract_strided_slice %210 {offsets = [0, 24], sizes = [16, 8], strides = [1, 1]} : vector<16x32xf32> to vector<16x8xf32>
    %236 = vector.shape_cast %235 : vector<16x8xf32> to vector<2x8x8xf32>
    %237 = tpu.concatenate %230, %232, %234, %236 in 0 : vector<2x8x8xf32>, vector<2x8x8xf32>, vector<2x8x8xf32>, vector<2x8x8xf32> -> vector<8x8x8xf32>
    "tpu.trace_start"() <{level = 10 : i32, message = "nqd,nkd->nqk"}> : () -> ()
    %cst_115 = arith.constant dense<0.000000e+00> : vector<8x8x8xf32>
    %238 = tpu.matmul %219, %228, %cst_115 {dimension_numbers = #tpu.dot_dimension_numbers<[2], [2], [1], [1], [0, 0, 0, 1, 1, 1], [0], [0]>} : vector<8x8x8xf32>, vector<8x8x8xf32>, vector<8x8x8xf32> -> vector<8x8x8xf32>
    "tpu.trace_stop"() : () -> ()
    %239 = vector.broadcast %0 : vector<8x1x8xf32> to vector<8x8x8xf32>
    %240 = arith.addf %238, %239 : vector<8x8x8xf32>
    %cst_116 = arith.constant dense<0xFF800000> : vector<8x8xf32>
    %241 = vector.multi_reduction <maximumf>, %240, %cst_116 [2] : vector<8x8x8xf32> to vector<8x8xf32>
    %242 = vector.shape_cast %241 : vector<8x8xf32> to vector<8x8x1xf32>
    %243 = vector.broadcast %242 : vector<8x8x1xf32> to vector<8x8x8xf32>
    %244 = arith.subf %240, %243 : vector<8x8x8xf32>
    %245 = math.exp %244 : vector<8x8x8xf32>
    %cst_117 = arith.constant dense<0.000000e+00> : vector<8x8xf32>
    %246 = vector.multi_reduction <add>, %245, %cst_117 [2] : vector<8x8x8xf32> to vector<8x8xf32>
    %247 = vector.shape_cast %246 : vector<8x8xf32> to vector<8x8x1xf32>
    %248 = tpu.reciprocal %247 {approx = true} : vector<8x8x1xf32> -> vector<8x8x1xf32>
    %249 = vector.broadcast %248 : vector<8x8x1xf32> to vector<8x8x8xf32>
    %250 = arith.mulf %245, %249 : vector<8x8x8xf32>
    "tpu.trace_start"() <{level = 10 : i32, message = "nqk,nkd->nqd"}> : () -> ()
    %cst_118 = arith.constant dense<0.000000e+00> : vector<8x8x8xf32>
    %251 = tpu.matmul %250, %237, %cst_118 {dimension_numbers = #tpu.dot_dimension_numbers<[2], [1], [1], [2], [0, 0, 0, 1, 1, 2], [0], [0]>} : vector<8x8x8xf32>, vector<8x8x8xf32>, vector<8x8x8xf32> -> vector<8x8x8xf32>
    "tpu.trace_stop"() : () -> ()
    %252 = vector.extract_strided_slice %251 {offsets = [0, 0, 0], sizes = [2, 8, 8], strides = [1, 1, 1]} : vector<8x8x8xf32> to vector<2x8x8xf32>
    %253 = vector.shape_cast %252 : vector<2x8x8xf32> to vector<16x8xf32>
    %254 = vector.extract_strided_slice %251 {offsets = [2, 0, 0], sizes = [2, 8, 8], strides = [1, 1, 1]} : vector<8x8x8xf32> to vector<2x8x8xf32>
    %255 = vector.shape_cast %254 : vector<2x8x8xf32> to vector<16x8xf32>
    %256 = vector.extract_strided_slice %251 {offsets = [4, 0, 0], sizes = [2, 8, 8], strides = [1, 1, 1]} : vector<8x8x8xf32> to vector<2x8x8xf32>
    %257 = vector.shape_cast %256 : vector<2x8x8xf32> to vector<16x8xf32>
    %258 = vector.extract_strided_slice %251 {offsets = [6, 0, 0], sizes = [2, 8, 8], strides = [1, 1, 1]} : vector<8x8x8xf32> to vector<2x8x8xf32>
    %259 = vector.shape_cast %258 : vector<2x8x8xf32> to vector<16x8xf32>
    %260 = tpu.concatenate %253, %255, %257, %259 in 1 : vector<16x8xf32>, vector<16x8xf32>, vector<16x8xf32>, vector<16x8xf32> -> vector<16x32xf32>
    %c1_119 = arith.constant 1 : index
    %c0_120 = arith.constant 0 : index
    %c0_121 = arith.constant 0 : index
    %261 = vector.load %arg6[%c1_119, %c0_120, %c0_121] : memref<2x32x32xbf16, #tpu.memory_space<vmem>>, vector<1x32x32xbf16>
    %262 = vector.shape_cast %261 : vector<1x32x32xbf16> to vector<32x32xbf16>
    %c1_122 = arith.constant 1 : index
    %c0_123 = arith.constant 0 : index
    %c0_124 = arith.constant 0 : index
    %263 = vector.load %arg7[%c1_122, %c0_123, %c0_124] : memref<2x1x32xf32, #tpu.memory_space<vmem>>, vector<1x1x32xf32>
    %264 = vector.shape_cast %263 : vector<1x1x32xf32> to vector<1x32xf32>
    %265 = arith.truncf %260 : vector<16x32xf32> to vector<16x32xbf16>
    %cst_125 = arith.constant dense<0.000000e+00> : vector<16x32xf32>
    %266 = tpu.matmul %265, %262, %cst_125 {dimension_numbers = #tpu.dot_dimension_numbers<[1], [0], [0], [1], [0, 0, 1, 1], [], []>} : vector<16x32xbf16>, vector<32x32xbf16>, vector<16x32xf32> -> vector<16x32xf32>
    %267 = vector.broadcast %264 : vector<1x32xf32> to vector<16x32xf32>
    %268 = arith.addf %266, %267 : vector<16x32xf32>
    %269 = arith.addf %188, %268 : vector<16x32xf32>
    %c1_126 = arith.constant 1 : index
    %c0_127 = arith.constant 0 : index
    %c0_128 = arith.constant 0 : index
    %270 = vector.load %arg8[%c1_126, %c0_127, %c0_128] : memref<2x1x32xf32, #tpu.memory_space<vmem>>, vector<1x1x32xf32>
    %271 = vector.shape_cast %270 : vector<1x1x32xf32> to vector<1x32xf32>
    %c1_129 = arith.constant 1 : index
    %c0_130 = arith.constant 0 : index
    %c0_131 = arith.constant 0 : index
    %272 = vector.load %arg9[%c1_129, %c0_130, %c0_131] : memref<2x1x32xf32, #tpu.memory_space<vmem>>, vector<1x1x32xf32>
    %273 = vector.shape_cast %272 : vector<1x1x32xf32> to vector<1x32xf32>
    %cst_132 = arith.constant dense<0.000000e+00> : vector<16xf32>
    %274 = vector.multi_reduction <add>, %269, %cst_132 [1] : vector<16x32xf32> to vector<16xf32>
    %275 = vector.shape_cast %274 : vector<16xf32> to vector<16x1xf32>
    %cst_133 = arith.constant 3.200000e+01 : f32
    %276 = vector.broadcast %cst_133 : f32 to vector<16x1xf32>
    %277 = arith.divf %275, %276 : vector<16x1xf32>
    %278 = vector.broadcast %277 : vector<16x1xf32> to vector<16x32xf32>
    %279 = arith.subf %269, %278 : vector<16x32xf32>
    %280 = arith.mulf %279, %279 : vector<16x32xf32>
    %cst_134 = arith.constant dense<0.000000e+00> : vector<16xf32>
    %281 = vector.multi_reduction <add>, %280, %cst_134 [1] : vector<16x32xf32> to vector<16xf32>
    %282 = vector.shape_cast %281 : vector<16xf32> to vector<16x1xf32>
    %cst_135 = arith.constant 3.200000e+01 : f32
    %283 = vector.broadcast %cst_135 : f32 to vector<16x1xf32>
    %284 = arith.divf %282, %283 : vector<16x1xf32>
    %285 = vector.broadcast %277 : vector<16x1xf32> to vector<16x32xf32>
    %286 = arith.subf %269, %285 : vector<16x32xf32>
    %cst_136 = arith.constant 9.99999996E-13 : f32
    %287 = vector.broadcast %cst_136 : f32 to vector<16x1xf32>
    %288 = arith.addf %284, %287 : vector<16x1xf32>
    %289 = math.rsqrt %288 : vector<16x1xf32>
    %290 = vector.broadcast %289 : vector<16x1xf32> to vector<16x32xf32>
    %291 = arith.mulf %286, %290 : vector<16x32xf32>
    %292 = vector.broadcast %271 : vector<1x32xf32> to vector<16x32xf32>
    %293 = arith.mulf %291, %292 : vector<16x32xf32>
    %294 = vector.broadcast %273 : vector<1x32xf32> to vector<16x32xf32>
    %295 = arith.addf %293, %294 : vector<16x32xf32>
    %c1_137 = arith.constant 1 : index
    %c0_138 = arith.constant 0 : index
    %c0_139 = arith.constant 0 : index
    %296 = vector.load %arg10[%c1_137, %c0_138, %c0_139] : memref<2x32x64xbf16, #tpu.memory_space<vmem>>, vector<1x32x64xbf16>
    %297 = vector.shape_cast %296 : vector<1x32x64xbf16> to vector<32x64xbf16>
    %c1_140 = arith.constant 1 : index
    %c0_141 = arith.constant 0 : index
    %c0_142 = arith.constant 0 : index
    %298 = vector.load %arg11[%c1_140, %c0_141, %c0_142] : memref<2x1x64xf32, #tpu.memory_space<vmem>>, vector<1x1x64xf32>
    %299 = vector.shape_cast %298 : vector<1x1x64xf32> to vector<1x64xf32>
    %300 = arith.truncf %295 : vector<16x32xf32> to vector<16x32xbf16>
    %cst_143 = arith.constant dense<0.000000e+00> : vector<16x64xf32>
    %301 = tpu.matmul %300, %297, %cst_143 {dimension_numbers = #tpu.dot_dimension_numbers<[1], [0], [0], [1], [0, 0, 1, 1], [], []>} : vector<16x32xbf16>, vector<32x64xbf16>, vector<16x64xf32> -> vector<16x64xf32>
    %302 = vector.broadcast %299 : vector<1x64xf32> to vector<16x64xf32>
    %303 = arith.addf %301, %302 : vector<16x64xf32>
    %304 = arith.mulf %303, %303 : vector<16x64xf32>
    %305 = arith.mulf %303, %304 : vector<16x64xf32>
    %cst_144 = arith.constant 4.471500e-02 : f32
    %306 = vector.broadcast %cst_144 : f32 to vector<16x64xf32>
    %307 = arith.mulf %306, %305 : vector<16x64xf32>
    %308 = arith.addf %303, %307 : vector<16x64xf32>
    %cst_145 = arith.constant 0.797884583 : f32
    %309 = vector.broadcast %cst_145 : f32 to vector<16x64xf32>
    %310 = arith.mulf %309, %308 : vector<16x64xf32>
    %311 = math.tanh %310 : vector<16x64xf32>
    %cst_146 = arith.constant 1.000000e+00 : f32
    %312 = vector.broadcast %cst_146 : f32 to vector<16x64xf32>
    %313 = arith.addf %312, %311 : vector<16x64xf32>
    %cst_147 = arith.constant 5.000000e-01 : f32
    %314 = vector.broadcast %cst_147 : f32 to vector<16x64xf32>
    %315 = arith.mulf %314, %313 : vector<16x64xf32>
    %316 = arith.mulf %303, %315 : vector<16x64xf32>
    %c1_148 = arith.constant 1 : index
    %c0_149 = arith.constant 0 : index
    %c0_150 = arith.constant 0 : index
    %317 = vector.load %arg12[%c1_148, %c0_149, %c0_150] : memref<2x64x32xbf16, #tpu.memory_space<vmem>>, vector<1x64x32xbf16>
    %318 = vector.shape_cast %317 : vector<1x64x32xbf16> to vector<64x32xbf16>
    %c1_151 = arith.constant 1 : index
    %c0_152 = arith.constant 0 : index
    %c0_153 = arith.constant 0 : index
    %319 = vector.load %arg13[%c1_151, %c0_152, %c0_153] : memref<2x1x32xf32, #tpu.memory_space<vmem>>, vector<1x1x32xf32>
    %320 = vector.shape_cast %319 : vector<1x1x32xf32> to vector<1x32xf32>
    %321 = arith.truncf %316 : vector<16x64xf32> to vector<16x64xbf16>
    %cst_154 = arith.constant dense<0.000000e+00> : vector<16x32xf32>
    %322 = tpu.matmul %321, %318, %cst_154 {dimension_numbers = #tpu.dot_dimension_numbers<[1], [0], [0], [1], [0, 0, 1, 1], [], []>} : vector<16x64xbf16>, vector<64x32xbf16>, vector<16x32xf32> -> vector<16x32xf32>
    %323 = vector.broadcast %320 : vector<1x32xf32> to vector<16x32xf32>
    %324 = arith.addf %322, %323 : vector<16x32xf32>
    %325 = arith.addf %295, %324 : vector<16x32xf32>
    %c1_155 = arith.constant 1 : index
    %c0_156 = arith.constant 0 : index
    %c0_157 = arith.constant 0 : index
    %326 = vector.load %arg14[%c1_155, %c0_156, %c0_157] : memref<2x1x32xf32, #tpu.memory_space<vmem>>, vector<1x1x32xf32>
    %327 = vector.shape_cast %326 : vector<1x1x32xf32> to vector<1x32xf32>
    %c1_158 = arith.constant 1 : index
    %c0_159 = arith.constant 0 : index
    %c0_160 = arith.constant 0 : index
    %328 = vector.load %arg15[%c1_158, %c0_159, %c0_160] : memref<2x1x32xf32, #tpu.memory_space<vmem>>, vector<1x1x32xf32>
    %329 = vector.shape_cast %328 : vector<1x1x32xf32> to vector<1x32xf32>
    %cst_161 = arith.constant dense<0.000000e+00> : vector<16xf32>
    %330 = vector.multi_reduction <add>, %325, %cst_161 [1] : vector<16x32xf32> to vector<16xf32>
    %331 = vector.shape_cast %330 : vector<16xf32> to vector<16x1xf32>
    %cst_162 = arith.constant 3.200000e+01 : f32
    %332 = vector.broadcast %cst_162 : f32 to vector<16x1xf32>
    %333 = arith.divf %331, %332 : vector<16x1xf32>
    %334 = vector.broadcast %333 : vector<16x1xf32> to vector<16x32xf32>
    %335 = arith.subf %325, %334 : vector<16x32xf32>
    %336 = arith.mulf %335, %335 : vector<16x32xf32>
    %cst_163 = arith.constant dense<0.000000e+00> : vector<16xf32>
    %337 = vector.multi_reduction <add>, %336, %cst_163 [1] : vector<16x32xf32> to vector<16xf32>
    %338 = vector.shape_cast %337 : vector<16xf32> to vector<16x1xf32>
    %cst_164 = arith.constant 3.200000e+01 : f32
    %339 = vector.broadcast %cst_164 : f32 to vector<16x1xf32>
    %340 = arith.divf %338, %339 : vector<16x1xf32>
    %341 = vector.broadcast %333 : vector<16x1xf32> to vector<16x32xf32>
    %342 = arith.subf %325, %341 : vector<16x32xf32>
    %cst_165 = arith.constant 9.99999996E-13 : f32
    %343 = vector.broadcast %cst_165 : f32 to vector<16x1xf32>
    %344 = arith.addf %340, %343 : vector<16x1xf32>
    %345 = math.rsqrt %344 : vector<16x1xf32>
    %346 = vector.broadcast %345 : vector<16x1xf32> to vector<16x32xf32>
    %347 = arith.mulf %342, %346 : vector<16x32xf32>
    %348 = vector.broadcast %327 : vector<1x32xf32> to vector<16x32xf32>
    %349 = arith.mulf %347, %348 : vector<16x32xf32>
    %350 = vector.broadcast %329 : vector<1x32xf32> to vector<16x32xf32>
    %351 = arith.addf %349, %350 : vector<16x32xf32>
    %352 = vector.shape_cast %351 : vector<16x32xf32> to vector<2x8x32xf32>
    %353 = vector.extract_strided_slice %352 {offsets = [0, 0, 0], sizes = [2, 1, 32], strides = [1, 1, 1]} : vector<2x8x32xf32> to vector<2x1x32xf32>
    %354 = vector.shape_cast %353 : vector<2x1x32xf32> to vector<2x32xf32>
    %c0_166 = arith.constant 0 : index
    %c0_167 = arith.constant 0 : index
    %355 = vector.load %arg16[%c0_166, %c0_167] : memref<32x32xbf16, #tpu.memory_space<vmem>>, vector<32x32xbf16>
    %c0_168 = arith.constant 0 : index
    %c0_169 = arith.constant 0 : index
    %356 = vector.load %arg17[%c0_168, %c0_169] : memref<1x32xf32, #tpu.memory_space<vmem>>, vector<1x32xf32>
    %357 = arith.truncf %354 : vector<2x32xf32> to vector<2x32xbf16>
    %cst_170 = arith.constant dense<0.000000e+00> : vector<2x32xf32>
    %358 = tpu.matmul %357, %355, %cst_170 {dimension_numbers = #tpu.dot_dimension_numbers<[1], [0], [0], [1], [0, 0, 1, 1], [], []>} : vector<2x32xbf16>, vector<32x32xbf16>, vector<2x32xf32> -> vector<2x32xf32>
    %359 = vector.broadcast %356 : vector<1x32xf32> to vector<2x32xf32>
    %360 = arith.addf %358, %359 : vector<2x32xf32>
    %361 = math.tanh %360 : vector<2x32xf32>
    %c0_171 = arith.constant 0 : index
    %c0_172 = arith.constant 0 : index
    %362 = vector.load %arg18[%c0_171, %c0_172] : memref<32x10xbf16, #tpu.memory_space<vmem>>, vector<32x10xbf16>
    %c0_173 = arith.constant 0 : index
    %c0_174 = arith.constant 0 : index
    %363 = vector.load %arg19[%c0_173, %c0_174] : memref<1x10xf32, #tpu.memory_space<vmem>>, vector<1x10xf32>
    %364 = arith.truncf %361 : vector<2x32xf32> to vector<2x32xbf16>
    %cst_175 = arith.constant dense<0.000000e+00> : vector<2x10xf32>
    %365 = tpu.matmul %364, %362, %cst_175 {dimension_numbers = #tpu.dot_dimension_numbers<[1], [0], [0], [1], [0, 0, 1, 1], [], []>} : vector<2x32xbf16>, vector<32x10xbf16>, vector<2x10xf32> -> vector<2x10xf32>
    %366 = vector.broadcast %363 : vector<1x10xf32> to vector<2x10xf32>
    %367 = arith.addf %365, %366 : vector<2x10xf32>
    %c0_176 = arith.constant 0 : index
    %c0_177 = arith.constant 0 : index
    %368 = vector.load %arg20[%c0_176, %c0_177] : memref<2x10xf32, #tpu.memory_space<vmem>>, vector<2x10xf32>
    tpu.vector_store %arg20[%c0_176, %c0_177], %367 {strides = array<i32>} : memref<2x10xf32, #tpu.memory_space<vmem>>, vector<2x10xf32>,
    return
  }
}

</mosaic_0001>

<bundles_post_ra>
// kernel: tpu_custom_call.1
= control target key start
LH: loop header
LB: loop body
LE: loop exit
PB: predicated region body
PF: predicated region fallthrough
CT: control target
= control target key end

     0   :  { %s3799_s0 = inlined_call_operand.hbm [shape: f32[16,32], index: 0, kind: input, shape index: {}]   ;;  %s3800_s1 = inlined_call_operand.hbm [shape: f32[8,1,8], index: 1, kind: input, shape index: {}]   ;;  %s3801_s2 = inlined_call_operand.hbm [shape: f32[1,32], index: 2, kind: input, shape index: {}]   ;;  %s3802_s3 = inlined_call_operand.hbm [shape: f32[1,32], index: 3, kind: input, shape index: {}]   ;;  %s3803_s4 = inlined_call_operand.vmem [shape: bf16[2,3,32,32], index: 4, kind: input, shape index: {}]   ;;  %s3804_s5 = inlined_call_operand.hbm [shape: f32[2,3,1,32], index: 5, kind: input, shape index: {}]   ;;  %s3805_s6 = inlined_call_operand.hbm [shape: bf16[2,32,32], index: 6, kind: input, shape index: {}]   ;;  %s3806_s7 = inlined_call_operand.hbm [shape: f32[2,1,32], index: 7, kind: input, shape index: {}]   ;;  %s3807_s8 = inlined_call_operand.hbm [shape: f32[2,1,32], index: 8, kind: input, shape index: {}]   ;;  %s3808_s9 = inlined_call_operand.hbm [shape: f32[2,1,32], index: 9, kind: input, shape index: {}]   ;;  %s3809_s10 = inlined_call_operand.hbm [shape: bf16[2,32,64], index: 10, kind: input, shape index: {}]   ;;  %s3810_s11 = inlined_call_operand.hbm [shape: f32[2,1,64], index: 11, kind: input, shape index: {}]   ;;  %s3811_s12 = inlined_call_operand.vmem [shape: bf16[2,64,32], index: 12, kind: input, shape index: {}]   ;;  %s3812_s13 = inlined_call_operand.hbm [shape: f32[2,1,32], index: 13, kind: input, shape index: {}]   ;;  %s3813_s14 = inlined_call_operand.hbm [shape: f32[2,1,32], index: 14, kind: input, shape index: {}]   ;;  %s3814_s15 = inlined_call_operand.hbm [shape: f32[2,1,32], index: 15, kind: input, shape index: {}]   ;;  %s3815_s16 = inlined_call_operand.hbm [shape: bf16[32,32], index: 16, kind: input, shape index: {}]   ;;  %s3816_s17 = inlined_call_operand.hbm [shape: f32[1,32], index: 17, kind: input, shape index: {}]   ;;  %s3817_s18 = inlined_call_operand.vmem [shape: bf16[32,10], index: 18, kind: input, shape index: {}]   ;;  %s3818_s19 = inlined_call_operand.vmem [shape: f32[1,10], index: 19, kind: input, shape index: {}]   ;;  %s3819_s20 = inlined_call_operand.hbm [shape: f32[2,10], index: 20, kind: output, shape index: {}]  }
   0x1   :  { %3821 = sst [smem:[#allocation39_spill]] %s3799_s0 }
   0x2   :  { %3822 = sst [smem:[#allocation40_spill]] %s3800_s1 }
   0x3   :  { %3823 = sst [smem:[#allocation41_spill]] %s3801_s2 }
   0x4   :  { %3824 = sst [smem:[#allocation42_spill]] %s3802_s3 }
   0x5   :  { %3825 = sst [smem:[#allocation43_spill]] %s3803_s4 }
   0x6   :  { %3826 = sst [smem:[#allocation44_spill]] %s3818_s19 }
   0x7   :  { %3827 = sst [smem:[#allocation45_spill]] %s3819_s20 }
   0x8   :  { %25 = vsyncpa [#allocation3], 0 }
   0x9   :  { %26 = vsyncpa [#allocation6], 0 }
   0xa   :  { %27 = vsyncpa [#allocation9], 0 }
   0xb   :  { %28 = vsyncpa [#allocation12], 0 }
   0xc   :  { %29 = vsyncpa [#allocation15], 0 }
   0xd   :  { %30 = vsyncpa [#allocation18], 0 }
   0xe   :  { %31 = vsyncpa [#allocation21], 0 }
   0xf   :  { %32 = vsyncpa [#allocation24], 0 }
  0x10   :  { %33 = vsyncpa [#allocation27], 0  ;;  %s3828_s23 = sld [smem:[#allocation40_spill]] }
  0x16   :  { %s52_s24 = sshll.u32 %s3828_s23, 4  ;;  %s53_s24 = int_to_ptr.hbm [resolvable:$true] %s52_s24 }
  0x17   :  { %34 = vsyncpa [#allocation4], 0  ;;  %s3251_s2 = smov [#allocation5]   ;;  %s3829_s27 = sld [smem:[#allocation42_spill]] }
  0x18   :  { %s54_s25 = sshll.u32 %s3251_s2, 4  ;;  %s3252_s4 = smov 16   ;;  %s55_s25 = int_to_ptr.vmem [resolvable:$true] %s54_s25 }
  0x19   :  { %s3253_s29 = smov 1   ;;  %s3254_s30 = smov [#allocation8]  }
  0x1a   :  { %60 = dma.hbm_to_vmem [thread:$0]  %s53_s24, 128, %s55_s25, [#allocation6], %s3252_s4, %s3252_s4, %s3253_s29  }
  0x1b   :  { %s79_s0 = sshll.u32 %s3254_s30, 4  ;;  %s102_s22 = sshll.u32 %s3805_s6, 4  ;;  %s80_s0 = int_to_ptr.vmem [resolvable:$true] %s79_s0  ;;  %s103_s22 = int_to_ptr.hbm [resolvable:$true] %s102_s22 }
  0x1c   :  { %s3255_s23 = smov [#allocation11]   ;;  %s3256_s20 = smov 64  }
  0x1d   :  { %s77_s28 = sshll.u32 %s3829_s27, 4  ;;  %s104_s2 = sshll.u32 %s3255_s23, 4  ;;  %s78_s28 = int_to_ptr.hbm [resolvable:$true] %s77_s28  ;;  %s105_s2 = int_to_ptr.vmem [resolvable:$true] %s104_s2 }
  0x1e   :  { %82 = dma.hbm_to_vmem [thread:$0]  %s78_s28, 16, %s80_s0, [#allocation9]  }
  0x1f   :  { %s128_s27 = sshll.u32 %s3807_s8, 4  ;;  %s3257_s19 = smov 4   ;;  %s129_s27 = int_to_ptr.hbm [resolvable:$true] %s128_s27 }
  0x20   :  { %110 = dma.hbm_to_vmem [thread:$0]  %s103_s22, 512, %s105_s2, [#allocation12], %s3256_s20, %s3256_s20, %s3257_s19  }
  0x21   :  { %s3258_s24 = smov [#allocation14]   ;;  %s154_s28 = sshll.u32 %s3809_s10, 4  ;;  %s155_s28 = int_to_ptr.hbm [resolvable:$true] %s154_s28 }
  0x22   :  { %s130_s25 = sshll.u32 %s3258_s24, 4  ;;  %s182_s21 = sshll.u32 %s3812_s13, 4  ;;  %s131_s25 = int_to_ptr.vmem [resolvable:$true] %s130_s25  ;;  %s183_s21 = int_to_ptr.hbm [resolvable:$true] %s182_s21 }
  0x23   :  { %136 = dma.hbm_to_vmem [thread:$0]  %s129_s27, 32, %s131_s25, [#allocation15], %s3252_s4, %s3252_s4, %s3253_s29  }
  0x24   :  { %s3259_s1 = smov [#allocation17]   ;;  %s3260_s22 = smov [#allocation20]  }
  0x25   :  { %s156_s23 = sshll.u32 %s3259_s1, 4  ;;  %s184_s10 = sshll.u32 %s3260_s22, 4  ;;  %s157_s23 = int_to_ptr.vmem [resolvable:$true] %s156_s23  ;;  %s185_s10 = int_to_ptr.vmem [resolvable:$true] %s184_s10 }
  0x26   :  { %162 = dma.hbm_to_vmem [thread:$0]  %s155_s28, 512, %s157_s23, [#allocation18], %s3256_s20, %s3256_s20, %s3257_s19  }
  0x27   :  { %s208_s26 = sshll.u32 %s3814_s15, 4  ;;  %s3830_s24 = sld [smem:[#allocation39_spill]]  ;;  %s209_s26 = int_to_ptr.hbm [resolvable:$true] %s208_s26 }
  0x28   :  { %190 = dma.hbm_to_vmem [thread:$0]  %s183_s21, 32, %s185_s10, [#allocation21], %s3252_s4, %s3252_s4, %s3253_s29  }
  0x29   :  { %s3261_s6 = smov [#allocation23]   ;;  %s3262_s28 = smov [#allocation2]  }
  0x2a   :  { %s210_s30 = sshll.u32 %s3261_s6, 4  ;;  %s41_s15 = sshll.u32 %s3262_s28, 4  ;;  %s211_s30 = int_to_ptr.vmem [resolvable:$true] %s210_s30  ;;  %s42_s15 = int_to_ptr.vmem [resolvable:$true] %s41_s15 }
  0x2b   :  { %216 = dma.hbm_to_vmem [thread:$0]  %s209_s26, 32, %s211_s30, [#allocation24], %s3252_s4, %s3252_s4, %s3253_s29  }
  0x2c   :  { %s3263_s8 = smov 128   ;;  %s3264_s0 = smov 8  }
  0x2d   :  { %s39_s25 = sshll.u32 %s3830_s24, 4  ;;  %s3831_s23 = sld [smem:[#allocation41_spill]]  ;;  %s40_s25 = int_to_ptr.hbm [resolvable:$true] %s39_s25 }
  0x2e   :  { %47 = dma.hbm_to_vmem [thread:$0]  %s40_s25, 256, %s42_s15, [#allocation3], %s3263_s8, %s3263_s8, %s3264_s0  }
  0x2f   :  { %s3265_s10 = smov [#allocation7]   ;;  %s89_s27 = sshll.u32 %s3804_s5, 4  ;;  %s90_s27 = int_to_ptr.hbm [resolvable:$true] %s89_s27 }
  0x30   :  { %s68_s2 = sshll.u32 %s3265_s10, 4  ;;  %s3266_s26 = smov [#allocation10]   ;;  %s69_s2 = int_to_ptr.vmem [resolvable:$true] %s68_s2 }
  0x31   :  { %s91_s24 = sshll.u32 %s3266_s26, 4  ;;  %s115_s25 = sshll.u32 %s3806_s7, 4  ;;  %s92_s24 = int_to_ptr.vmem [resolvable:$true] %s91_s24  ;;  %s116_s25 = int_to_ptr.hbm [resolvable:$true] %s115_s25 }
  0x32   :  { %97 = dma.hbm_to_vmem [thread:$0]  %s90_s27, 96, %s92_s24, [#allocation9], %s3252_s4, %s3252_s4, %s3253_s29  }
  0x33   :  { %s66_s22 = sshll.u32 %s3831_s23, 4  ;;  %s141_s8 = sshll.u32 %s3808_s9, 4  ;;  %s67_s22 = int_to_ptr.hbm [resolvable:$true] %s66_s22  ;;  %s142_s8 = int_to_ptr.hbm [resolvable:$true] %s141_s8 }
  0x34   :  { %71 = dma.hbm_to_vmem [thread:$0]  %s67_s22, 16, %s69_s2, [#allocation6]  }
  0x35   :  { %s3267_s21 = smov [#allocation13]   ;;  %s3268_s1 = smov [#allocation16]  }
  0x36   :  { %s117_s5 = sshll.u32 %s3267_s21, 4  ;;  %s143_s7 = sshll.u32 %s3268_s1, 4  ;;  %s118_s5 = int_to_ptr.vmem [resolvable:$true] %s117_s5  ;;  %s144_s7 = int_to_ptr.vmem [resolvable:$true] %s143_s7 }
  0x37   :  { %123 = dma.hbm_to_vmem [thread:$0]  %s116_s25, 32, %s118_s5, [#allocation12], %s3252_s4, %s3252_s4, %s3253_s29  }
  0x38   :  { %s167_s10 = sshll.u32 %s3810_s11, 4  ;;  %s195_s3 = sshll.u32 %s3813_s14, 4  ;;  %s168_s10 = int_to_ptr.hbm [resolvable:$true] %s167_s10  ;;  %s196_s3 = int_to_ptr.hbm [resolvable:$true] %s195_s3 }
  0x39   :  { %149 = dma.hbm_to_vmem [thread:$0]  %s142_s8, 32, %s144_s7, [#allocation15], %s3252_s4, %s3252_s4, %s3253_s29  }
  0x3a   :  { %s3269_s13 = smov [#allocation19]   ;;  %s3270_s26 = smov [#allocation22]  }
  0x3b   :  { %s169_s27 = sshll.u32 %s3269_s13, 4  ;;  %s197_s11 = sshll.u32 %s3270_s26, 4  ;;  %s170_s27 = int_to_ptr.vmem [resolvable:$true] %s169_s27  ;;  %s198_s11 = int_to_ptr.vmem [resolvable:$true] %s197_s11 }
  0x3c   :  { %175 = dma.hbm_to_vmem [thread:$0]  %s168_s10, 32, %s170_s27, [#allocation18], %s3252_s4, %s3252_s4, %s3253_s29  }
  0x3d   :  { %s221_s30 = sshll.u32 %s3815_s16, 4  ;;  %s235_s28 = sshll.u32 %s3816_s17, 4  ;;  %s222_s30 = int_to_ptr.hbm [resolvable:$true] %s221_s30  ;;  %s236_s28 = int_to_ptr.hbm [resolvable:$true] %s235_s28 }
  0x3e   :  { %203 = dma.hbm_to_vmem [thread:$0]  %s196_s3, 32, %s198_s11, [#allocation21], %s3252_s4, %s3252_s4, %s3253_s29  }
  0x3f   :  { %s3271_s15 = smov [#allocation25]   ;;  %s3272_s21 = smov [#allocation26]  }
  0x40   :  { %s223_s8 = sshll.u32 %s3271_s15, 4  ;;  %s237_s16 = sshll.u32 %s3272_s21, 4  ;;  %s224_s8 = int_to_ptr.vmem [resolvable:$true] %s223_s8  ;;  %s238_s16 = int_to_ptr.vmem [resolvable:$true] %s237_s16 }
  0x41   :  { %229 = dma.hbm_to_vmem [thread:$0]  %s222_s30, 256, %s224_s8, [#allocation24], %s3256_s20, %s3256_s20, %s3257_s19  }
  0x42   :  { %240 = dma.hbm_to_vmem [thread:$0]  %s236_s28, 16, %s238_s16, [#allocation27]  }
  0x43   :  { %3231 = dma.done.wait [#allocation3], 256  }
  0x44   :  { %3232 = vsyncadd [#allocation3], 4294967040 }
  0x45   :  { %3233 = dma.done.wait [#allocation6], 144  }
  0x46   :  { %3234 = vsyncadd [#allocation6], 4294967152 }
  0x47   :  { %3235 = dma.done.wait [#allocation9], 112  }
  0x48   :  { %3236 = vsyncadd [#allocation9], 4294967184 }
  0x49   :  { %3237 = dma.done.wait [#allocation12], 544  }
  0x4a   :  { %3238 = vsyncadd [#allocation12], 4294966752 }
  0x4b   :  { %3239 = dma.done.wait [#allocation15], 64  }
  0x4c   :  { %3240 = vsyncadd [#allocation15], 4294967232 }
  0x4d   :  { %3241 = dma.done.wait [#allocation18], 544  }
  0x4e   :  { %3242 = vsyncadd [#allocation18], 4294966752 }
  0x4f   :  { %3243 = dma.done.wait [#allocation21], 64  }
  0x50   :  { %3244 = vsyncadd [#allocation21], 4294967232 }
  0x51   :  { %3245 = dma.done.wait [#allocation24], 288  }
  0x52   :  { %3246 = vsyncadd [#allocation24], 4294967008 }
  0x53   :  { %3247 = dma.done.wait [#allocation27], 16  }
  0x54   :  { %3248 = vsyncadd [#allocation27], 4294967280  ;;  %vm322_vm0 = vcmask 261120   ;;  %v318_v0 = vld [vmem:[#allocation2] sm:$0xff]  ;;  %v319_v1 = vld [vmem:[#allocation2 + $0x8] sm:$0xff]  ;;  %v3273_v4 = vmov 32.0  }
  0x55   :  { %v323_v2 = vsel %vm322_vm0, %v318_v0, 0.0  ;;  %v326_v3 = vsel %vm322_vm0, %v319_v1, 0.0  ;;  %2727 = vrcp.f32 %v3273_v4  ;;  %s3832_s20 = sld [smem:[#allocation43_spill]]  ;;  %v2695_v46 = vld [vmem:[#allocation7] ss:$0 sm:$0xff]  ;;  %vm566_vm8 = vcmask 64512  }
  0x56   :  { %324 = vadd.xlane.f32.xlu0 %v323_v2  ;;  %v2696_v51 = vld [vmem:[#allocation8] ss:$0 sm:$0xff]  ;;  %v2698_v56 = vld [vmem:[#allocation10 + $0x1] ss:$0 sm:$0xff]  ;;  %v2697_v57 = vld [vmem:[#allocation10] ss:$0 sm:$0xff] }
  0x57   :  { %s3274_s13 = smov 120   ;;  %s3275_s27 = smov 104   ;;  %vm1057_vm9 = vcmask 130048   ;;  %vm1060_vm10 = vcmask 195584  }
  0x58   :  { %s3276_s26 = smov 112   ;;  %s3277_s11 = smov 24  }
  0x59   :  { %s3833_s25 = sld [smem:[#allocation44_spill]]  ;;  %s3278_s28 = smov [#allocation28]  }
  0x5a   :  { %s2347_s15 = sshll.u32 %s3278_s28, 4  ;;  %s3834_s16 = sld [smem:[#allocation45_spill]]  ;;  %s2348_s15 = int_to_ptr.vmem [resolvable:$true] %s2347_s15 }
  0x5b   :  { %v2728_v5 = vpop.eup %2727  ;;  %v2586_v21 = vld [vmem:[%s3832_s20 + $0x8] sm:$0xff]  ;;  %v2588_v22 = vld [vmem:[%s3832_s20 + $0x18] sm:$0xff]  ;;  %v2585_v25 = vld [vmem:[%s3832_s20] sm:$0xff] }
  0x5c   :  { %v330_v6 = vmul.f32 32.0, %v2728_v5  ;;  %vm334_vm1 = vweird.f32 %v2728_v5  ;;  %v2590_v23 = vld [vmem:[%s3832_s20 + $0x28] sm:$0xff]  ;;  %414 = vmatpush.bf16.msra.mxu0 %v2586_v21  ;;  %450 = vmatpush.bf16.msra.mxu1 %v2588_v22  ;;  %v2587_v26 = vld [vmem:[%s3832_s20 + $0x10] sm:$0xff]  ;;  %v2589_v28 = vld [vmem:[%s3832_s20 + $0x20] sm:$0xff] }
  0x5d   :  { %486 = vmatpush.bf16.msra.mxu2 %v2590_v23 }
  0x5e   :  { %327 = vadd.xlane.f32.xlu0 %v326_v3  ;;  %v331_v7 = vsub.f32 1.0, %v330_v6 }
  0x60   :  { %v332_v8 = vmul.f32 %v2728_v5, %v331_v7  ;;  %415 = vmatpush.bf16.msra.mxu0 %v2585_v25  ;;  %451 = vmatpush.bf16.msra.mxu1 %v2587_v26  ;;  %v2699_v7 = vld [vmem:[#allocation10 + $0x2] ss:$0 sm:$0xff] }
  0x61   :  { %487 = vmatpush.bf16.msra.mxu2 %v2589_v28  ;;  %v3548_v28 = vld [vmem:[#allocation5 + $0x2] ss:$0 sm:$0xff] }
  0x62   :  { %v333_v9 = vadd.f32 %v2728_v5, %v332_v8 }
  0x64   :  { %v3471_v10 = vsel %vm334_vm1, %v2728_v5, %v333_v9 }
  0xc9   :  { %v325_v11 = vpop.xlane.xlu0 %324 }
  0xca   :  { %v336_v12 = vmul.f32 %v3471_v10, %v325_v11 }
  0xcc   :  { %v338_v13 = vsub.f32 %v318_v0, %v336_v12 }
  0xce   :  { %v340_v14 = vmul.f32 %v338_v13, %v338_v13 }
  0xd0   :  { %v342_v15 = vsel %vm322_vm0, %v340_v14, 0.0 }
  0xd1   :  { %343 = vadd.xlane.f32.xlu1 %v342_v15  ;;  %v328_v16 = vpop.xlane.xlu0 %327 }
  0xd2   :  { %v337_v17 = vmul.f32 %v3471_v10, %v328_v16 }
  0xd4   :  { %v339_v18 = vsub.f32 %v319_v1, %v337_v17 }
  0xd6   :  { %v341_v19 = vmul.f32 %v339_v18, %v339_v18 }
  0xd8   :  { %v345_v20 = vsel %vm322_vm0, %v341_v19, 0.0 }
  0xd9   :  { %346 = vadd.xlane.f32.xlu1 %v345_v20 }
 0x144   :  { %v344_v24 = vpop.xlane.xlu1 %343 }
 0x145   :  { %v348_v27 = vmul.f32 %v344_v24, %v3471_v10  ;;  %v3543_v24 = vld [vmem:[#allocation5 + $0x1] ss:$0 sm:$0xff] }
 0x147   :  { %v350_v29 = vadd.f32 1e-12, %v348_v27 }
 0x149   :  { %2729 = vrsqrt.f32 %v350_v29  ;;  %vm358_vm3 = vweird.f32 %v350_v29 }
 0x14c   :  { %v347_v30 = vpop.xlane.xlu1 %346 }
 0x14d   :  { %v349_v31 = vmul.f32 %v347_v30, %v3471_v10 }
 0x14f   :  { %v2730_v32 = vpop.eup %2729  ;;  %v351_v33 = vadd.f32 1e-12, %v349_v31 }
 0x150   :  { %v353_v34 = vmul.f32 %v2730_v32, %v350_v29  ;;  %vm359_vm2 = vweird.f32 %v2730_v32 }
 0x151   :  { %2731 = vrsqrt.f32 %v351_v33  ;;  %vm360_vm4 = vmor %vm358_vm3, %vm359_vm2  ;;  %vm368_vm6 = vweird.f32 %v351_v33  ;;  %vm1252_vm2 = vcmask 523264  }
 0x152   :  { %v354_v35 = vmul.f32 %v2730_v32, %v353_v34  ;;  %v3554_v34 = vld [vmem:[#allocation5 + $0x7] ss:$0 sm:$0xff] }
 0x154   :  { %v355_v36 = vmul.f32 0.5, %v354_v35  ;;  %v3556_v35 = vld [vmem:[#allocation5 + $0x6] ss:$0 sm:$0xff] }
 0x156   :  { %v356_v37 = vsub.f32 1.5, %v355_v36 }
 0x157   :  { %v2732_v38 = vpop.eup %2731 }
 0x158   :  { %v357_v39 = vmul.f32 %v2730_v32, %v356_v37  ;;  %v363_v40 = vmul.f32 %v2732_v38, %v351_v33  ;;  %vm369_vm5 = vweird.f32 %v2732_v38  ;;  %v3552_v33 = vld [vmem:[#allocation5 + $0x4] ss:$0 sm:$0xff] }
 0x159   :  { %vm370_vm7 = vmor %vm368_vm6, %vm369_vm5 }
 0x15a   :  { %v364_v41 = vmul.f32 %v2732_v38, %v363_v40  ;;  %v361_v42 = vsel %vm360_vm4, %v2730_v32, %v357_v39 }
 0x15b   :  { %v372_v45 = vmul.f32 %v361_v42, %v338_v13 }
 0x15c   :  { %v365_v43 = vmul.f32 0.5, %v364_v41 }
 0x15d   :  { %v377_v50 = vmul.f32 %v2695_v46, %v372_v45 }
 0x15e   :  { %v366_v44 = vsub.f32 1.5, %v365_v43 }
 0x15f   :  { %v3497_v53 = vadd.f32 %v2696_v51, %v377_v50 }
 0x160   :  { %v367_v47 = vmul.f32 %v2732_v38, %v366_v44  ;;  %v3561_v44 = vld [vmem:[#allocation5 + $0x3] ss:$0 sm:$0xff] }
 0x162   :  { %v371_v48 = vsel %vm370_vm7, %v2732_v38, %v367_v47 }
 0x163   :  { %v373_v49 = vmul.f32 %v371_v48, %v339_v18  ;;  %v3534_v18 = vld [vmem:[#allocation5] ss:$0 sm:$0xff] }
 0x165   :  { %v378_v52 = vmul.f32 %v2695_v46, %v373_v49  ;;  %v3564_v46 = vld [vmem:[#allocation5 + $0x5] ss:$0 sm:$0xff] }
 0x167   :  { %v3499_v54 = vadd.f32 %v2696_v51, %v378_v52 }
 0x169   :  { %v384_v55 = vpack.c.bf16 %v3499_v54, %v3497_v53 }
 0x16b   :  { %2375 = vmatmul.msk.bf16.vlgmr.msra.gmra.mxu0 %vm322_vm0, %v384_v55  ;;  %2388 = vmatmul.msk.bf16.vlgmr.msra.gmra.mxu1 %vm322_vm0, %v384_v55 }
 0x16c   :  { %2401 = vmatmul.msk.bf16.vlgmr.msra.gmra.mxu2 %vm322_vm0, %v384_v55 }
 0x1e8   :  { %v417_v58 = vpop.f32.mrf.mxu0  ;;  %v453_v59 = vpop.f32.mrf.mxu1 }
 0x1e9   :  { %v454_v60 = vadd.f32 %v2698_v56, %v453_v59  ;;  %v418_v61 = vadd.f32 %v2697_v57, %v417_v58 }
 0x1eb   :  { %510 = vrot.lane.b32.xlu2 %v454_v60, %s3274_s13  ;;  %2402 = vmatpush.xpose.msk.msra.mxu3 %vm566_vm8, %v454_v60 }
 0x1ee   :  { %2403 = vmatmul.msk.f32.vlgmr.msra.gmra.mxu3 %vm566_vm8, %v418_v61 }
 0x1ef   :  { %v489_v4 = vpop.f32.mrf.mxu2 }
 0x1f0   :  { %v419_v62 = vpop.f32.mrf.mxu0  ;;  %v455_v63 = vpop.f32.mrf.mxu1  ;;  %v3532_v15 = vadd.f32 %v2699_v7, %v489_v4 }
 0x1f1   :  { %v420_v0 = vadd.f32 %v2697_v57, %v419_v62  ;;  %v456_v1 = vadd.f32 %v2698_v56, %v455_v63 }
 0x1f3   :  { %512 = vrot.lane.b32.xlu0 %v456_v1, %s3274_s13  ;;  %2404 = vmatpush.xpose.msk.msrb.mxu3 %vm566_vm8, %v456_v1 }
 0x1f4   :  { %498 = vrot.lane.b32.xlu1 %v420_v0, %s3274_s13  ;;  %496 = vrot.lane.b32.xlu2 %v418_v61, %s3274_s13 }
 0x1f6   :  { %2405 = vmatmul.msk.f32.vlgmr.msrb.gmra.mxu3 %vm566_vm8, %v420_v0 }
 0x1f7   :  { %v491_v6 = vpop.f32.mrf.mxu2 }
 0x1f8   :  { %v3524_v8 = vadd.f32 %v2699_v7, %v491_v6 }
 0x1fa   :  { %v2645_v59 = vpack.i.bf16 %v3524_v8, %v3532_v15 }
 0x1fb   :  { %504 = vrot.lane.b32.xlu0 %v418_v61, %s3275_s27 }
 0x1fc   :  { %520 = vrot.lane.b32.xlu1 %v456_v1, %s3275_s27  ;;  %518 = vrot.lane.b32.xlu2 %v454_v60, %s3275_s27 }
 0x203   :  { %500 = vrot.lane.b32.xlu0 %v418_v61, %s3276_s26 }
 0x204   :  { %516 = vrot.lane.b32.xlu2 %v456_v1, %s3276_s26 }
 0x20c   :  { %502 = vrot.lane.b32.xlu2 %v420_v0, %s3276_s26 }
 0x214   :  { %514 = vrot.lane.b32.xlu2 %v454_v60, %s3276_s26 }
 0x21c   :  { %506 = vrot.lane.b32.xlu2 %v420_v0, %s3275_s27 }
 0x245   :  { %v511_v2 = vpop.permute.xlu2 %510 }
 0x246   :  { %2406 = vmatpush.xpose.msk.msra.mxu3 %vm566_vm8, %v511_v2 }
 0x24e   :  { %v497_v3 = vpop.permute.xlu2 %496 }
 0x24f   :  { %2407 = vmatmul.msk.f32.vlgmr.msra.gmra.mxu3 %vm566_vm8, %v497_v3 }
 0x256   :  { %v519_v5 = vpop.permute.xlu2 %518 }
 0x25e   :  { %v517_v9 = vpop.permute.xlu2 %516 }
 0x25f   :  { %2412 = vmatpush.xpose.msk.msrb.mxu2 %vm566_vm8, %v517_v9 }
 0x263   :  { %888 = vmatpush.msra.mxu2 %v3524_v8 }
 0x265   :  { %v513_v11 = vpop.permute.xlu0 %512 }
 0x266   :  { %v499_v12 = vpop.permute.xlu1 %498  ;;  %v503_v13 = vpop.permute.xlu2 %502  ;;  %2408 = vmatpush.xpose.msk.msrb.mxu3 %vm566_vm8, %v513_v11 }
 0x267   :  { %2413 = vmatmul.msk.f32.vlgmr.msrb.gmra.mxu2 %vm566_vm8, %v503_v13 }
 0x269   :  { %2409 = vmatmul.msk.f32.vlgmr.msrb.gmra.mxu3 %vm566_vm8, %v499_v12 }
 0x26a   :  { %2414 = vmatpush.xpose.msk.msra.mxu3 %vm566_vm8, %v519_v5 }
 0x26d   :  { %v505_v14 = vpop.permute.xlu0 %504 }
 0x26e   :  { %v521_v16 = vpop.permute.xlu1 %520  ;;  %v515_v17 = vpop.permute.xlu2 %514 }
 0x26f   :  { %2410 = vmatpush.xpose.msk.msrb.mxu1 %vm566_vm8, %v515_v17  ;;  %2416 = vmatpush.xpose.msk.msrb.mxu0 %vm566_vm8, %v521_v16 }
 0x271   :  { %v588_v19 = vpop.f32.mrf.mxu3  ;;  %2415 = vmatmul.msk.f32.vlgmr.msra.gmra.mxu3 %vm566_vm8, %v505_v14 }
 0x272   :  { %v589_v20 = vadd.f32 %v3534_v18, %v588_v19 }
 0x273   :  { %865 = vmatpush.msra.mxu1 %v3532_v15 }
 0x274   :  { %v759_v21 = vsel %vm566_vm8, %v589_v20, -inf }
 0x275   :  { %v501_v22 = vpop.permute.xlu0 %500  ;;  %760 = vmax.xlane.f32.xlu2 %v759_v21 }
 0x276   :  { %v507_v23 = vpop.permute.xlu2 %506  ;;  %2411 = vmatmul.msk.f32.vlgmr.msrb.gmra.mxu1 %vm566_vm8, %v501_v22 }
 0x277   :  { %2417 = vmatmul.msk.f32.vlgmr.msrb.gmra.mxu0 %vm566_vm8, %v507_v23 }
 0x279   :  { %v612_v25 = vpop.f32.mrf.mxu3 }
 0x27a   :  { %v613_v26 = vadd.f32 %v3543_v24, %v612_v25 }
 0x27c   :  { %v762_v27 = vsel %vm566_vm8, %v613_v26, -inf }
 0x27d   :  { %763 = vmax.xlane.f32.xlu1 %v762_v27 }
 0x2d2   :  { %v636_v29 = vpop.f32.mrf.mxu3 }
 0x2d3   :  { %v637_v30 = vadd.f32 %v3548_v28, %v636_v29 }
 0x2d5   :  { %v765_v31 = vsel %vm566_vm8, %v637_v30, -inf }
 0x2d6   :  { %766 = vmax.xlane.f32.xlu0 %v765_v31 }
 0x2e8   :  { %v761_v36 = vpop.xlane.xlu2 %760 }
 0x2e9   :  { %v783_v43 = vsub.f32 %v589_v20, %v761_v36 }
 0x2ea   :  { %v708_v49 = vpop.f32.mrf.mxu2 }
 0x2eb   :  { %v791_v50 = vmul.f32 1.442695, %v783_v43  ;;  %v709_v52 = vadd.f32 %v3564_v46, %v708_v49 }
 0x2ec   :  { %v660_v32 = vpop.f32.mrf.mxu3 }
 0x2ed   :  { %v661_v51 = vadd.f32 %v3561_v44, %v660_v32  ;;  %2733 = vpow2.f32 %v791_v50  ;;  %v774_v56 = vsel %vm566_vm8, %v709_v52, -inf }
 0x2ef   :  { %v768_v55 = vsel %vm566_vm8, %v661_v51, -inf }
 0x2f0   :  { %v764_v60 = vpop.xlane.xlu1 %763 }
 0x2f1   :  { %v784_v61 = vsub.f32 %v613_v26, %v764_v60 }
 0x2f3   :  { %v684_v37 = vpop.f32.mrf.mxu1  ;;  %v2734_v57 = vpop.eup %2733  ;;  %v793_v62 = vmul.f32 1.442695, %v784_v61 }
 0x2f4   :  { %v685_v38 = vadd.f32 %v3552_v33, %v684_v37  ;;  %v756_v39 = vpop.f32.mrf.mxu0  ;;  %v732_v40 = vpop.f32.mrf.mxu3  ;;  %v807_v58 = vsel %vm566_vm8, %v2734_v57, 0.0 }
 0x2f5   :  { %v757_v41 = vadd.f32 %v3554_v34, %v756_v39  ;;  %v733_v42 = vadd.f32 %v3556_v35, %v732_v40  ;;  %2735 = vpow2.f32 %v793_v62 }
 0x2f6   :  { %v771_v45 = vsel %vm566_vm8, %v685_v38, -inf }
 0x2f7   :  { %v780_v47 = vsel %vm566_vm8, %v757_v41, -inf  ;;  %772 = vmax.xlane.f32.xlu1 %v771_v45  ;;  %v777_v48 = vsel %vm566_vm8, %v733_v42, -inf }
 0x2f8   :  { %781 = vmax.xlane.f32.xlu0 %v780_v47  ;;  %778 = vmax.xlane.f32.xlu2 %v777_v48 }
 0x2fb   :  { %v2736_v63 = vpop.eup %2735 }
 0x2fc   :  { %v810_v0 = vsel %vm566_vm8, %v2736_v63, 0.0 }
 0x2ff   :  { %769 = vmax.xlane.f32.xlu1 %v768_v55 }
 0x300   :  { %775 = vmax.xlane.f32.xlu0 %v774_v56 }
 0x308   :  { %808 = vadd.xlane.f32.xlu0 %v807_v58 }
 0x310   :  { %2646 = vrot.lane.b32.xlu2 %v2645_v59, %s3274_s13 }
 0x339   :  { %811 = vadd.xlane.f32.xlu2 %v810_v0 }
 0x349   :  { %v767_v1 = vpop.xlane.xlu0 %766 }
 0x34a   :  { %v785_v7 = vsub.f32 %v637_v30, %v767_v1 }
 0x34c   :  { %v795_v13 = vmul.f32 1.442695, %v785_v7 }
 0x36a   :  { %v773_v2 = vpop.xlane.xlu1 %772 }
 0x36b   :  { %v782_v3 = vpop.xlane.xlu0 %781  ;;  %v787_v4 = vsub.f32 %v685_v38, %v773_v2  ;;  %v779_v5 = vpop.xlane.xlu2 %778 }
 0x36c   :  { %v790_v6 = vsub.f32 %v757_v41, %v782_v3  ;;  %v789_v12 = vsub.f32 %v733_v42, %v779_v5 }
 0x36d   :  { %v799_v9 = vmul.f32 1.442695, %v787_v4 }
 0x36e   :  { %v805_v11 = vmul.f32 1.442695, %v790_v6  ;;  %v803_v14 = vmul.f32 1.442695, %v789_v12 }
 0x36f   :  { %2737 = vpow2.f32 %v799_v9 }
 0x370   :  { %2739 = vpow2.f32 %v805_v11 }
 0x371   :  { %2741 = vpow2.f32 %v795_v13 }
 0x372   :  { %v770_v16 = vpop.xlane.xlu1 %769  ;;  %2743 = vpow2.f32 %v803_v14 }
 0x373   :  { %v776_v17 = vpop.xlane.xlu0 %775  ;;  %v786_v19 = vsub.f32 %v661_v51, %v770_v16  ;;  %v2647_v20 = vpop.permute.xlu2 %2646 }
 0x374   :  { %v2649_v21 = vunpack.i.h.bf16 %v2647_v20  ;;  %v2648_v22 = vunpack.i.l.bf16 %v2647_v20  ;;  %v788_v25 = vsub.f32 %v709_v52, %v776_v17 }
 0x375   :  { %v2738_v23 = vpop.eup %2737  ;;  %v797_v26 = vmul.f32 1.442695, %v786_v19 }
 0x376   :  { %v2740_v27 = vpop.eup %2739  ;;  %911 = vmatpush.msrb.mxu3 %v2648_v22  ;;  %934 = vmatpush.msra.mxu0 %v2649_v21  ;;  %v819_v29 = vsel %vm566_vm8, %v2738_v23, 0.0  ;;  %v801_v31 = vmul.f32 1.442695, %v788_v25  ;;  %v2592_v25 = vld [vmem:[#allocation11 + $0x8] sm:$0xff] }
 0x377   :  { %2745 = vpow2.f32 %v797_v26  ;;  %820 = vadd.xlane.f32.xlu1 %v819_v29  ;;  %v828_v30 = vsel %vm566_vm8, %v2740_v27, 0.0  ;;  %v2742_v32 = vpop.eup %2741  ;;  %v2591_v26 = vld [vmem:[#allocation11] sm:$0xff] }
 0x378   :  { %829 = vadd.xlane.f32.xlu0 %v828_v30  ;;  %v2744_v37 = vpop.eup %2743  ;;  %v813_v39 = vsel %vm566_vm8, %v2742_v32, 0.0 }
 0x379   :  { %v825_v41 = vsel %vm566_vm8, %v2744_v37, 0.0 }
 0x37b   :  { %v809_v36 = vpop.xlane.xlu0 %808 }
 0x37c   :  { %2747 = vrcp.f32 %v809_v36 }
 0x37d   :  { %v2746_v38 = vpop.eup %2745  ;;  %2749 = vpow2.f32 %v801_v31 }
 0x37e   :  { %v816_v40 = vsel %vm566_vm8, %v2746_v38, 0.0 }
 0x37f   :  { %814 = vadd.xlane.f32.xlu1 %v813_v39  ;;  %817 = vadd.xlane.f32.xlu2 %v816_v40 }
 0x380   :  { %826 = vadd.xlane.f32.xlu0 %v825_v41 }
 0x382   :  { %v2748_v42 = vpop.eup %2747 }
 0x383   :  { %v2750_v43 = vpop.eup %2749  ;;  %v839_v45 = vmul.f32 %v2748_v42, %v2734_v57 }
 0x384   :  { %v822_v47 = vsel %vm566_vm8, %v2750_v43, 0.0 }
 0x385   :  { %2418 = vmatmul.msk.f32.vlgmr.msra.gmra.mxu1 %vm566_vm8, %v839_v45 }
 0x387   :  { %823 = vadd.xlane.f32.xlu1 %v822_v47 }
 0x394   :  { %536 = vrot.lane.b32.xlu0 %v3532_v15, %s3275_s27 }
 0x397   :  { %530 = vrot.lane.b32.xlu2 %v3532_v15, %s3276_s26 }
 0x39f   :  { %538 = vrot.lane.b32.xlu2 %v3524_v8, %s3275_s27 }
 0x3a0   :  { %532 = vrot.lane.b32.xlu1 %v3524_v8, %s3276_s26 }
 0x3ac   :  { %v812_v48 = vpop.xlane.xlu2 %811 }
 0x3ad   :  { %2751 = vrcp.f32 %v812_v48 }
 0x3b3   :  { %v2752_v49 = vpop.eup %2751 }
 0x3b4   :  { %v840_v50 = vmul.f32 %v2752_v49, %v2736_v63  ;;  %v2708_v49 = vld [vmem:[#allocation13] ss:$0 sm:$0xff] }
 0x3b6   :  { %2419 = vmatmul.msk.f32.vlgmr.msra.gmra.mxu2 %vm566_vm8, %v840_v50 }
 0x3ea   :  { %v821_v51 = vpop.xlane.xlu1 %820 }
 0x3eb   :  { %v830_v52 = vpop.xlane.xlu0 %829  ;;  %2753 = vrcp.f32 %v821_v51 }
 0x3f1   :  { %v2754_v15 = vpop.eup %2753 }
 0x3f2   :  { %v815_v55 = vpop.xlane.xlu1 %814  ;;  %v818_v56 = vpop.xlane.xlu2 %817  ;;  %v843_v58 = vmul.f32 %v2754_v15, %v2738_v23 }
 0x3f3   :  { %2755 = vrcp.f32 %v815_v55  ;;  %v827_v60 = vpop.xlane.xlu0 %826 }
 0x3f4   :  { %2757 = vrcp.f32 %v818_v56 }
 0x3f5   :  { %2759 = vrcp.f32 %v830_v52 }
 0x3f6   :  { %2761 = vrcp.f32 %v827_v60 }
 0x3f9   :  { %v2756_v57 = vpop.eup %2755 }
 0x3fa   :  { %v841_v59 = vmul.f32 %v2756_v57, %v2742_v32  ;;  %v531_v61 = vpop.permute.xlu2 %530  ;;  %v2758_v8 = vpop.eup %2757 }
 0x3fb   :  { %957 = vmatpush.msrb.mxu1 %v531_v61  ;;  %v842_v62 = vmul.f32 %v2758_v8, %v2746_v38  ;;  %v2760_v63 = vpop.eup %2759  ;;  %v824_v4 = vpop.xlane.xlu1 %823 }
 0x3fc   :  { %2420 = vmatmul.msk.f32.vlgmr.msrb.gmra.mxu3 %vm566_vm8, %v841_v59  ;;  %2422 = vmatmul.msk.f32.vlgmr.msrb.gmra.mxu1 %vm566_vm8, %v843_v58  ;;  %v2762_v1 = vpop.eup %2761  ;;  %v846_v2 = vmul.f32 %v2760_v63, %v2740_v27  ;;  %2763 = vrcp.f32 %v824_v4 }
 0x3fd   :  { %2421 = vmatmul.msk.f32.vlgmr.msra.gmra.mxu0 %vm566_vm8, %v842_v62  ;;  %v845_v3 = vmul.f32 %v2762_v1, %v2744_v37  ;;  %1093 = vmatpush.bf16.msra.mxu1 %v2592_v25 }
 0x401   :  { %1094 = vmatpush.bf16.msra.mxu1 %v2591_v26 }
 0x402   :  { %v539_v0 = vpop.permute.xlu2 %538  ;;  %v2764_v6 = vpop.eup %2763 }
 0x403   :  { %1026 = vmatpush.msrb.mxu0 %v539_v0  ;;  %v844_v7 = vmul.f32 %v2764_v6, %v2750_v43  ;;  %v867_v19 = vpop.f32.mrf.mxu1  ;;  %v2593_v6 = vld [vmem:[#allocation17] sm:$0xff] }
 0x405   :  { %2425 = vmatmul.msk.f32.vlgmr.msrb.gmra.mxu0 %vm566_vm8, %v846_v2 }
 0x406   :  { %v537_v5 = vpop.permute.xlu0 %536 }
 0x407   :  { %1003 = vmatpush.msra.mxu3 %v537_v5 }
 0x408   :  { %2424 = vmatmul.msk.f32.vlgmr.msra.gmra.mxu3 %vm566_vm8, %v845_v3  ;;  %v2594_v3 = vld [vmem:[#allocation17 + $0x8] sm:$0xff] }
 0x412   :  { %v533_v9 = vpop.permute.xlu1 %532 }
 0x413   :  { %980 = vmatpush.msrb.mxu2 %v533_v9 }
 0x414   :  { %2423 = vmatmul.msk.f32.vlgmr.msrb.gmra.mxu2 %vm566_vm8, %v844_v7 }
 0x415   :  { %1189 = vmatpush.bf16.msra.mxu2 %v2594_v3 }
 0x419   :  { %1190 = vmatpush.bf16.msra.mxu2 %v2593_v6  ;;  %v2712_v6 = vld [vmem:[#allocation20] ss:$0 sm:$0xff] }
 0x439   :  { %v890_v20 = vpop.f32.mrf.mxu2 }
 0x479   :  { %v959_v21 = vpop.f32.mrf.mxu1 }
 0x47a   :  { %v936_v11 = vpop.f32.mrf.mxu0 }
 0x47f   :  { %v913_v12 = vpop.f32.mrf.mxu3 }
 0x480   :  { %v2650_v13 = vpack.i.bf16 %v936_v11, %v913_v12 }
 0x482   :  { %2651 = vrot.lane.b32.xlu0 %v2650_v13, %s3264_s0  ;;  %v1028_v14 = vpop.f32.mrf.mxu0 }
 0x48b   :  { %v1005_v16 = vpop.f32.mrf.mxu3 }
 0x48c   :  { %v2660_v17 = vpack.i.bf16 %v1028_v14, %v1005_v16 }
 0x48e   :  { %2661 = vrot.lane.b32.xlu2 %v2660_v17, %s3277_s11 }
 0x497   :  { %v982_v22 = vpop.f32.mrf.mxu2 }
 0x498   :  { %v2655_v23 = vpack.i.bf16 %v982_v22, %v959_v21 }
 0x49a   :  { %2656 = vrot.lane.b32.xlu1 %v2655_v23, %s3252_s4 }
 0x4e8   :  { %v2662_v31 = vpop.permute.xlu2 %2661 }
 0x4e9   :  { %v2664_v38 = vunpack.i.h.bf16 %v2662_v31  ;;  %v2663_v39 = vunpack.i.l.bf16 %v2662_v31 }
 0x4f4   :  { %v2652_v27 = vpop.permute.xlu0 %2651 }
 0x4f5   :  { %v2654_v29 = vunpack.i.h.bf16 %v2652_v27  ;;  %v2653_v30 = vunpack.i.l.bf16 %v2652_v27  ;;  %v2709_v27 = vld [vmem:[#allocation14] ss:$0 sm:$0xff] }
 0x4f7   :  { %v1056_v40 = vsel %vm566_vm8, %v890_v20, %v2654_v29  ;;  %v1055_v41 = vsel %vm566_vm8, %v867_v19, %v2653_v30 }
 0x50c   :  { %v2657_v32 = vpop.permute.xlu1 %2656 }
 0x50d   :  { %v2659_v36 = vunpack.i.h.bf16 %v2657_v32  ;;  %v2658_v37 = vunpack.i.l.bf16 %v2657_v32  ;;  %v2710_v32 = vld [vmem:[#allocation16] ss:$0 sm:$0xff] }
 0x50f   :  { %v1058_v42 = vsel %vm1057_vm9, %v1055_v41, %v2658_v37  ;;  %v1059_v43 = vsel %vm1057_vm9, %v1056_v40, %v2659_v36 }
 0x510   :  { %v1061_v45 = vsel %vm1060_vm10, %v1058_v42, %v2663_v39  ;;  %v1062_v47 = vsel %vm1060_vm10, %v1059_v43, %v2664_v38  ;;  %v2598_v42 = vld [vmem:[%s3811_s12 + $0x18] sm:$0xff]  ;;  %v2597_v43 = vld [vmem:[%s3811_s12 + $0x10] sm:$0xff] }
 0x511   :  { %v1068_v48 = vpack.c.bf16 %v1062_v47, %v1061_v45  ;;  %1260 = vmatpush.bf16.msrb.mxu3 %v2598_v42  ;;  %v2711_v45 = vld [vmem:[#allocation19] ss:$0 sm:$0xff]  ;;  %v2603_v42 = vld [vmem:[%s3832_s20 + $0x50] sm:$0xff] }
 0x512   :  { %v2596_v47 = vld [vmem:[%s3811_s12 + $0x8] sm:$0xff] }
 0x513   :  { %2434 = vmatmul.msk.bf16.vlgmr.msra.gmra.mxu1 %vm322_vm0, %v1068_v48 }
 0x515   :  { %1261 = vmatpush.bf16.msrb.mxu3 %v2597_v43 }
 0x519   :  { %1262 = vmatpush.bf16.msrb.mxu3 %v2596_v47 }
 0x590   :  { %v1096_v50 = vpop.f32.mrf.mxu1 }
 0x591   :  { %v1097_v51 = vadd.f32 %v2708_v49, %v1096_v50  ;;  %v2595_v50 = vld [vmem:[%s3811_s12] sm:$0xff] }
 0x592   :  { %1263 = vmatpush.bf16.msrb.mxu3 %v2595_v50 }
 0x593   :  { %v1101_v52 = vadd.f32 %v1097_v51, %v3497_v53 }
 0x595   :  { %v1105_v55 = vsel %vm322_vm0, %v1101_v52, 0.0 }
 0x596   :  { %1106 = vadd.xlane.f32.xlu0 %v1105_v55 }
 0x598   :  { %v1098_v56 = vpop.f32.mrf.mxu1 }
 0x599   :  { %v1099_v15 = vadd.f32 %v2708_v49, %v1098_v56 }
 0x59b   :  { %v1102_v57 = vadd.f32 %v1099_v15, %v3499_v54 }
 0x59d   :  { %v1108_v58 = vsel %vm322_vm0, %v1102_v57, 0.0 }
 0x59e   :  { %1109 = vadd.xlane.f32.xlu1 %v1108_v58 }
 0x609   :  { %v1107_v59 = vpop.xlane.xlu0 %1106 }
 0x60a   :  { %v1111_v60 = vmul.f32 %v1107_v59, %v3471_v10 }
 0x60c   :  { %v1113_v61 = vsub.f32 %v1101_v52, %v1111_v60 }
 0x60e   :  { %v1115_v8 = vmul.f32 %v1113_v61, %v1113_v61 }
 0x610   :  { %v1117_v62 = vsel %vm322_vm0, %v1115_v8, 0.0 }
 0x611   :  { %v1110_v63 = vpop.xlane.xlu1 %1109  ;;  %1118 = vadd.xlane.f32.xlu2 %v1117_v62 }
 0x612   :  { %v1112_v53 = vmul.f32 %v1110_v63, %v3471_v10 }
 0x614   :  { %v1114_v0 = vsub.f32 %v1102_v57, %v1112_v53 }
 0x616   :  { %v1116_v1 = vmul.f32 %v1114_v0, %v1114_v0 }
 0x618   :  { %v1120_v2 = vsel %vm322_vm0, %v1116_v1, 0.0 }
 0x619   :  { %1121 = vadd.xlane.f32.xlu0 %v1120_v2 }
 0x684   :  { %v1119_v54 = vpop.xlane.xlu2 %1118 }
 0x685   :  { %v1123_v4 = vmul.f32 %v1119_v54, %v3471_v10 }
 0x687   :  { %v1125_v5 = vadd.f32 1e-12, %v1123_v4 }
 0x689   :  { %2765 = vrsqrt.f32 %v1125_v5  ;;  %vm1133_vm12 = vweird.f32 %v1125_v5 }
 0x68c   :  { %v1122_v7 = vpop.xlane.xlu0 %1121 }
 0x68d   :  { %v1124_v9 = vmul.f32 %v1122_v7, %v3471_v10 }
 0x68f   :  { %v2766_v11 = vpop.eup %2765  ;;  %v1126_v12 = vadd.f32 1e-12, %v1124_v9 }
 0x690   :  { %v1128_v13 = vmul.f32 %v2766_v11, %v1125_v5  ;;  %vm1134_vm11 = vweird.f32 %v2766_v11 }
 0x691   :  { %2767 = vrsqrt.f32 %v1126_v12  ;;  %vm1135_vm13 = vmor %vm1133_vm12, %vm1134_vm11  ;;  %vm1143_vm15 = vweird.f32 %v1126_v12 }
 0x692   :  { %v1129_v14 = vmul.f32 %v2766_v11, %v1128_v13 }
 0x694   :  { %v1130_v16 = vmul.f32 0.5, %v1129_v14 }
 0x696   :  { %v1131_v17 = vsub.f32 1.5, %v1130_v16 }
 0x697   :  { %v2768_v19 = vpop.eup %2767 }
 0x698   :  { %v1132_v20 = vmul.f32 %v2766_v11, %v1131_v17  ;;  %v1138_v21 = vmul.f32 %v2768_v19, %v1126_v12  ;;  %vm1144_vm14 = vweird.f32 %v2768_v19 }
 0x699   :  { %vm1145_vm1 = vmor %vm1143_vm15, %vm1144_vm14 }
 0x69a   :  { %v1139_v22 = vmul.f32 %v2768_v19, %v1138_v21  ;;  %v1136_v23 = vsel %vm1135_vm13, %v2766_v11, %v1132_v20 }
 0x69b   :  { %v1147_v29 = vmul.f32 %v1136_v23, %v1113_v61 }
 0x69c   :  { %v1140_v25 = vmul.f32 0.5, %v1139_v22 }
 0x69d   :  { %v1152_v36 = vmul.f32 %v2709_v27, %v1147_v29 }
 0x69e   :  { %v1141_v26 = vsub.f32 1.5, %v1140_v25 }
 0x69f   :  { %v1157_v39 = vadd.f32 %v2710_v32, %v1152_v36  ;;  %v2600_v36 = vld [vmem:[%s3832_s20 + $0x38] sm:$0xff] }
 0x6a0   :  { %v1142_v30 = vmul.f32 %v2768_v19, %v1141_v26  ;;  %1360 = vmatpush.bf16.msra.mxu0 %v2600_v36 }
 0x6a2   :  { %v1146_v31 = vsel %vm1145_vm1, %v2768_v19, %v1142_v30 }
 0x6a3   :  { %v1148_v37 = vmul.f32 %v1146_v31, %v1114_v0 }
 0x6a5   :  { %v1153_v38 = vmul.f32 %v2709_v27, %v1148_v37  ;;  %v2604_v37 = vld [vmem:[%s3832_s20 + $0x58] sm:$0xff] }
 0x6a6   :  { %1432 = vmatpush.bf16.msrb.mxu2 %v2604_v37 }
 0x6a7   :  { %v1158_v40 = vadd.f32 %v2710_v32, %v1153_v38  ;;  %v2602_v32 = vld [vmem:[%s3832_s20 + $0x48] sm:$0xff] }
 0x6a8   :  { %1396 = vmatpush.bf16.msrb.mxu1 %v2602_v32 }
 0x6a9   :  { %v1164_v41 = vpack.c.bf16 %v1158_v40, %v1157_v39 }
 0x6aa   :  { %1433 = vmatpush.bf16.msrb.mxu2 %v2603_v42 }
 0x6ab   :  { %2443 = vmatmul.msk.bf16.vlgmr.msra.gmra.mxu2 %vm322_vm0, %v1164_v41  ;;  %v2601_v41 = vld [vmem:[%s3832_s20 + $0x40] sm:$0xff] }
 0x6ac   :  { %1397 = vmatpush.bf16.msrb.mxu1 %v2601_v41 }
 0x72e   :  { %v1192_v48 = vpop.f32.mrf.mxu2 }
 0x72f   :  { %v1193_v49 = vadd.f32 %v2711_v45, %v1192_v48 }
 0x731   :  { %v1197_v51 = vmul.f32 %v1193_v49, %v1193_v49 }
 0x733   :  { %v1199_v52 = vmul.f32 %v1197_v51, %v1193_v49 }
 0x735   :  { %v1201_v55 = vmul.f32 0.044715, %v1199_v52 }
 0x736   :  { %v1194_v56 = vpop.f32.mrf.mxu2 }
 0x737   :  { %v1203_v15 = vadd.f32 %v1201_v55, %v1193_v49  ;;  %v1195_v57 = vadd.f32 %v2711_v45, %v1194_v56 }
 0x739   :  { %v1205_v58 = vmul.f32 0.7978846, %v1203_v15  ;;  %v1198_v59 = vmul.f32 %v1195_v57, %v1195_v57 }
 0x73b   :  { %v1200_v60 = vmul.f32 %v1198_v59, %v1195_v57  ;;  %2769 = vtanh.f32 %v1205_v58 }
 0x73d   :  { %v1202_v61 = vmul.f32 0.044715, %v1200_v60 }
 0x73f   :  { %v1204_v8 = vadd.f32 %v1202_v61, %v1195_v57  ;;  %v2713_v61 = vld [vmem:[#allocation22] ss:$0 sm:$0xff] }
 0x741   :  { %v1206_v62 = vmul.f32 0.7978846, %v1204_v8  ;;  %v2770_v63 = vpop.eup %2769 }
 0x742   :  { %v1209_v53 = vadd.f32 1.0, %v2770_v63 }
 0x743   :  { %2771 = vtanh.f32 %v1206_v62 }
 0x744   :  { %v1211_v1 = vmul.f32 0.5, %v1209_v53  ;;  %v2714_v53 = vld [vmem:[#allocation23] ss:$0 sm:$0xff] }
 0x746   :  { %v1213_v3 = vmul.f32 %v1211_v1, %v1193_v49 }
 0x749   :  { %v2772_v0 = vpop.eup %2771 }
 0x74a   :  { %v1210_v2 = vadd.f32 1.0, %v2772_v0 }
 0x74c   :  { %v1212_v54 = vmul.f32 0.5, %v1210_v2 }
 0x74e   :  { %v1214_v4 = vmul.f32 %v1212_v54, %v1195_v57 }
 0x750   :  { %v1224_v5 = vpack.c.bf16 %v1214_v4, %v1213_v3 }
 0x752   :  { %2460 = vmatmul.msk.bf16.vlgmr.msrb.gmra.mxu3 %vm1252_vm2, %v1224_v5  ;;  %v2715_v5 = vld [vmem:[#allocation10 + $0x3] ss:$0 sm:$0xff] }
 0x7d5   :  { %v1265_v7 = vpop.f32.mrf.mxu3 }
 0x7d6   :  { %v1266_v9 = vadd.f32 %v2712_v6, %v1265_v7 }
 0x7d8   :  { %v1270_v11 = vadd.f32 %v1266_v9, %v1157_v39 }
 0x7da   :  { %v1274_v12 = vsel %vm322_vm0, %v1270_v11, 0.0 }
 0x7db   :  { %1275 = vadd.xlane.f32.xlu1 %v1274_v12 }
 0x7dd   :  { %v1267_v13 = vpop.f32.mrf.mxu3 }
 0x7de   :  { %v1268_v14 = vadd.f32 %v2712_v6, %v1267_v13  ;;  %v2716_v6 = vld [vmem:[#allocation10 + $0x4] ss:$0 sm:$0xff] }
 0x7e0   :  { %v1271_v16 = vadd.f32 %v1268_v14, %v1158_v40  ;;  %v2599_v40 = vld [vmem:[%s3832_s20 + $0x30] sm:$0xff] }
 0x7e1   :  { %1361 = vmatpush.bf16.msra.mxu0 %v2599_v40 }
 0x7e2   :  { %v1277_v17 = vsel %vm322_vm0, %v1271_v16, 0.0 }
 0x7e3   :  { %1278 = vadd.xlane.f32.xlu2 %v1277_v17 }
 0x84e   :  { %v1276_v19 = vpop.xlane.xlu1 %1275 }
 0x84f   :  { %v1280_v20 = vmul.f32 %v1276_v19, %v3471_v10  ;;  %v2717_v19 = vld [vmem:[#allocation10 + $0x5] ss:$0 sm:$0xff] }
 0x851   :  { %v1282_v21 = vsub.f32 %v1270_v11, %v1280_v20 }
 0x853   :  { %v1284_v22 = vmul.f32 %v1282_v21, %v1282_v21 }
 0x855   :  { %v1286_v23 = vsel %vm322_vm0, %v1284_v22, 0.0 }
 0x856   :  { %v1279_v25 = vpop.xlane.xlu2 %1278  ;;  %1287 = vadd.xlane.f32.xlu0 %v1286_v23 }
 0x857   :  { %v1281_v26 = vmul.f32 %v1279_v25, %v3471_v10 }
 0x859   :  { %v1283_v27 = vsub.f32 %v1271_v16, %v1281_v26 }
 0x85b   :  { %v1285_v29 = vmul.f32 %v1283_v27, %v1283_v27 }
 0x85d   :  { %v1289_v30 = vsel %vm322_vm0, %v1285_v29, 0.0 }
 0x85e   :  { %1290 = vadd.xlane.f32.xlu1 %v1289_v30 }
 0x8c9   :  { %v1288_v31 = vpop.xlane.xlu0 %1287 }
 0x8ca   :  { %v1292_v38 = vmul.f32 %v1288_v31, %v3471_v10 }
 0x8cc   :  { %v1294_v39 = vadd.f32 1e-12, %v1292_v38 }
 0x8ce   :  { %2773 = vrsqrt.f32 %v1294_v39  ;;  %vm1302_vm4 = vweird.f32 %v1294_v39 }
 0x8d1   :  { %v1291_v43 = vpop.xlane.xlu1 %1290 }
 0x8d2   :  { %v1293_v45 = vmul.f32 %v1291_v43, %v3471_v10 }
 0x8d4   :  { %v2774_v47 = vpop.eup %2773  ;;  %v1295_v48 = vadd.f32 1e-12, %v1293_v45 }
 0x8d5   :  { %v1297_v49 = vmul.f32 %v2774_v47, %v1294_v39  ;;  %vm1303_vm3 = vweird.f32 %v2774_v47 }
 0x8d6   :  { %2775 = vrsqrt.f32 %v1295_v48  ;;  %vm1304_vm5 = vmor %vm1302_vm4, %vm1303_vm3  ;;  %vm1312_vm7 = vweird.f32 %v1295_v48 }
 0x8d7   :  { %v1298_v50 = vmul.f32 %v2774_v47, %v1297_v49 }
 0x8d9   :  { %v1299_v51 = vmul.f32 0.5, %v1298_v50 }
 0x8db   :  { %v1300_v52 = vsub.f32 1.5, %v1299_v51 }
 0x8dc   :  { %v2776_v55 = vpop.eup %2775 }
 0x8dd   :  { %v1301_v56 = vmul.f32 %v2774_v47, %v1300_v52  ;;  %v1307_v15 = vmul.f32 %v2776_v55, %v1295_v48  ;;  %vm1313_vm6 = vweird.f32 %v2776_v55 }
 0x8de   :  { %vm1314_vm11 = vmor %vm1312_vm7, %vm1313_vm6  ;;  %vm2271_vm6 = vcmask 1041409   ;;  %vm2340_vm7 = vcmask 74752  }
 0x8df   :  { %v1308_v57 = vmul.f32 %v2776_v55, %v1307_v15  ;;  %v1305_v58 = vsel %vm1304_vm5, %v2774_v47, %v1301_v56 }
 0x8e0   :  { %v1316_v8 = vmul.f32 %v1305_v58, %v1282_v21 }
 0x8e1   :  { %v1309_v59 = vmul.f32 0.5, %v1308_v57 }
 0x8e2   :  { %v1321_v0 = vmul.f32 %v2713_v61, %v1316_v8 }
 0x8e3   :  { %v1310_v60 = vsub.f32 1.5, %v1309_v59 }
 0x8e4   :  { %v3659_v54 = vadd.f32 %v2714_v53, %v1321_v0 }
 0x8e5   :  { %v1311_v62 = vmul.f32 %v2776_v55, %v1310_v60 }
 0x8e7   :  { %v1315_v63 = vsel %vm1314_vm11, %v2776_v55, %v1311_v62 }
 0x8e8   :  { %v1317_v1 = vmul.f32 %v1315_v63, %v1283_v27 }
 0x8ea   :  { %v1322_v2 = vmul.f32 %v2713_v61, %v1317_v1 }
 0x8ec   :  { %v3661_v3 = vadd.f32 %v2714_v53, %v1322_v2 }
 0x8ee   :  { %v1328_v4 = vpack.c.bf16 %v3661_v3, %v3659_v54 }
 0x8f0   :  { %2473 = vmatmul.msk.bf16.vlgmr.msra.gmra.mxu0 %vm322_vm0, %v1328_v4  ;;  %2486 = vmatmul.msk.bf16.vlgmr.msrb.gmra.mxu1 %vm322_vm0, %v1328_v4 }
 0x8f1   :  { %2499 = vmatmul.msk.bf16.vlgmr.msrb.gmra.mxu2 %vm322_vm0, %v1328_v4 }
 0x96d   :  { %v1363_v7 = vpop.f32.mrf.mxu0  ;;  %v1399_v9 = vpop.f32.mrf.mxu1 }
 0x96e   :  { %v1364_v11 = vadd.f32 %v2715_v5, %v1363_v7  ;;  %v1400_v12 = vadd.f32 %v2716_v6, %v1399_v9 }
 0x970   :  { %1460 = vrot.lane.b32.xlu2 %v1400_v12, %s3276_s26  ;;  %2500 = vmatpush.xpose.msk.msrb.mxu0 %vm566_vm8, %v1400_v12 }
 0x971   :  { %1446 = vrot.lane.b32.xlu1 %v1364_v11, %s3276_s26 }
 0x973   :  { %2501 = vmatmul.msk.f32.vlgmr.msrb.gmra.mxu0 %vm566_vm8, %v1364_v11 }
 0x974   :  { %v1435_v20 = vpop.f32.mrf.mxu2 }
 0x975   :  { %v1401_v13 = vpop.f32.mrf.mxu1  ;;  %v1365_v14 = vpop.f32.mrf.mxu0  ;;  %v3684_v21 = vadd.f32 %v2717_v19, %v1435_v20 }
 0x976   :  { %v1402_v16 = vadd.f32 %v2716_v6, %v1401_v13  ;;  %v1366_v17 = vadd.f32 %v2715_v5, %v1365_v14 }
 0x978   :  { %1462 = vrot.lane.b32.xlu0 %v1402_v16, %s3276_s26  ;;  %2502 = vmatpush.xpose.msk.msra.mxu3 %vm566_vm8, %v1402_v16 }
 0x979   :  { %1456 = vrot.lane.b32.xlu2 %v1400_v12, %s3274_s13  ;;  %1458 = vrot.lane.b32.xlu1 %v1402_v16, %s3274_s13 }
 0x97b   :  { %2503 = vmatmul.msk.f32.vlgmr.msra.gmra.mxu3 %vm566_vm8, %v1366_v17 }
 0x97c   :  { %v1437_v26 = vpop.f32.mrf.mxu2 }
 0x97d   :  { %v3690_v27 = vadd.f32 %v2717_v19, %v1437_v26 }
 0x980   :  { %1448 = vrot.lane.b32.xlu0 %v1366_v17, %s3276_s26 }
 0x981   :  { %1444 = vrot.lane.b32.xlu2 %v1366_v17, %s3274_s13  ;;  %1464 = vrot.lane.b32.xlu1 %v1400_v12, %s3275_s27 }
 0x988   :  { %1442 = vrot.lane.b32.xlu0 %v1364_v11, %s3274_s13 }
 0x989   :  { %1450 = vrot.lane.b32.xlu2 %v1364_v11, %s3275_s27  ;;  %1452 = vrot.lane.b32.xlu1 %v1366_v17, %s3275_s27 }
 0x990   :  { %1466 = vrot.lane.b32.xlu0 %v1402_v16, %s3275_s27 }
 0x9ca   :  { %v1461_v22 = vpop.permute.xlu2 %1460 }
 0x9cb   :  { %2508 = vmatpush.xpose.msk.msra.mxu2 %vm566_vm8, %v1461_v22 }
 0x9cf   :  { %1786 = vmatpush.msrb.mxu2 %v3684_v21 }
 0x9d3   :  { %v1457_v23 = vpop.permute.xlu2 %1456 }
 0x9d4   :  { %2504 = vmatpush.xpose.msk.msra.mxu0 %vm566_vm8, %v1457_v23 }
 0x9db   :  { %v1445_v31 = vpop.permute.xlu2 %1444 }
 0x9e3   :  { %v1447_v25 = vpop.permute.xlu1 %1446  ;;  %v1451_v45 = vpop.permute.xlu2 %1450 }
 0x9e4   :  { %2509 = vmatmul.msk.f32.vlgmr.msra.gmra.mxu2 %vm566_vm8, %v1447_v25 }
 0x9ea   :  { %v1463_v29 = vpop.permute.xlu0 %1462 }
 0x9eb   :  { %v1459_v30 = vpop.permute.xlu1 %1458  ;;  %2510 = vmatpush.xpose.msk.msrb.mxu3 %vm566_vm8, %v1463_v29 }
 0x9ec   :  { %2506 = vmatpush.xpose.msk.msra.mxu1 %vm566_vm8, %v1459_v30 }
 0x9ef   :  { %1809 = vmatpush.msra.mxu3 %v3690_v27  ;;  %2507 = vmatmul.msk.f32.vlgmr.msra.gmra.mxu1 %vm566_vm8, %v1445_v31 }
 0x9f0   :  { %v1509_v32 = vpop.f32.mrf.mxu0 }
 0x9f1   :  { %v1510_v36 = vadd.f32 %v3534_v18, %v1509_v32 }
 0x9f2   :  { %v1449_v37 = vpop.permute.xlu0 %1448 }
 0x9f3   :  { %v1465_v38 = vpop.permute.xlu1 %1464  ;;  %2511 = vmatmul.msk.f32.vlgmr.msrb.gmra.mxu3 %vm566_vm8, %v1449_v37  ;;  %v1680_v39 = vsel %vm566_vm8, %v1510_v36, -inf }
 0x9f4   :  { %2512 = vmatpush.xpose.msk.msrb.mxu0 %vm566_vm8, %v1465_v38  ;;  %1681 = vmax.xlane.f32.xlu0 %v1680_v39 }
 0x9fa   :  { %v1443_v40 = vpop.permute.xlu0 %1442 }
 0x9fb   :  { %2505 = vmatmul.msk.f32.vlgmr.msra.gmra.mxu0 %vm566_vm8, %v1443_v40  ;;  %v1453_v47 = vpop.permute.xlu1 %1452 }
 0x9fe   :  { %v1533_v41 = vpop.f32.mrf.mxu3 }
 0x9ff   :  { %v1534_v42 = vadd.f32 %v3543_v24, %v1533_v41 }
 0xa01   :  { %v1683_v43 = vsel %vm566_vm8, %v1534_v42, -inf }
 0xa02   :  { %1684 = vmax.xlane.f32.xlu2 %v1683_v43  ;;  %v1467_v18 = vpop.permute.xlu0 %1466 }
 0xa03   :  { %2513 = vmatmul.msk.f32.vlgmr.msrb.gmra.mxu0 %vm566_vm8, %v1451_v45  ;;  %2514 = vmatpush.xpose.msk.msrb.mxu1 %vm566_vm8, %v1467_v18 }
 0xa06   :  { %2515 = vmatmul.msk.f32.vlgmr.msrb.gmra.mxu1 %vm566_vm8, %v1453_v47 }
 0xa67   :  { %v1605_v48 = vpop.f32.mrf.mxu2  ;;  %v1682_v55 = vpop.xlane.xlu0 %1681 }
 0xa68   :  { %v1606_v49 = vadd.f32 %v3552_v33, %v1605_v48  ;;  %v1704_v57 = vsub.f32 %v1510_v36, %v1682_v55 }
 0xa6a   :  { %v1692_v50 = vsel %vm566_vm8, %v1606_v49, -inf  ;;  %v1712_v33 = vmul.f32 1.442695, %v1704_v57 }
 0xa6b   :  { %1693 = vmax.xlane.f32.xlu2 %v1692_v50 }
 0xa6c   :  { %v1581_v51 = vpop.f32.mrf.mxu1  ;;  %2777 = vpow2.f32 %v1712_v33 }
 0xa6d   :  { %v1582_v24 = vadd.f32 %v3561_v44, %v1581_v51 }
 0xa6f   :  { %v1689_v52 = vsel %vm566_vm8, %v1582_v24, -inf }
 0xa70   :  { %1690 = vmax.xlane.f32.xlu0 %v1689_v52  ;;  %v2675_v52 = vpack.i.bf16 %v3690_v27, %v3684_v21 }
 0xa72   :  { %v2778_v4 = vpop.eup %2777 }
 0xa73   :  { %v1728_v6 = vsel %vm566_vm8, %v2778_v4, 0.0 }
 0xa75   :  { %v1685_v56 = vpop.xlane.xlu2 %1684 }
 0xa76   :  { %v1705_v59 = vsub.f32 %v1534_v42, %v1685_v56  ;;  %v1629_v61 = vpop.f32.mrf.mxu3 }
 0xa77   :  { %v1630_v62 = vadd.f32 %v3564_v46, %v1629_v61 }
 0xa78   :  { %v1557_v15 = vpop.f32.mrf.mxu0  ;;  %v1714_v8 = vmul.f32 1.442695, %v1705_v59 }
 0xa79   :  { %v1558_v58 = vadd.f32 %v3548_v28, %v1557_v15  ;;  %v1695_v0 = vsel %vm566_vm8, %v1630_v62, -inf }
 0xa7a   :  { %2779 = vpow2.f32 %v1714_v8 }
 0xa7b   :  { %v1686_v60 = vsel %vm566_vm8, %v1558_v58, -inf }
 0xa7c   :  { %1687 = vmax.xlane.f32.xlu1 %v1686_v60 }
 0xa80   :  { %v1653_v63 = vpop.f32.mrf.mxu0  ;;  %v2780_v5 = vpop.eup %2779 }
 0xa81   :  { %v1654_v44 = vadd.f32 %v3556_v35, %v1653_v63  ;;  %v1731_v46 = vsel %vm566_vm8, %v2780_v5, 0.0 }
 0xa83   :  { %v1677_v53 = vpop.f32.mrf.mxu1  ;;  %v1698_v1 = vsel %vm566_vm8, %v1654_v44, -inf }
 0xa84   :  { %v1678_v28 = vadd.f32 %v3554_v34, %v1677_v53  ;;  %1696 = vmax.xlane.f32.xlu1 %v1695_v0  ;;  %1699 = vmax.xlane.f32.xlu0 %v1698_v1 }
 0xa86   :  { %v1701_v2 = vsel %vm566_vm8, %v1678_v28, -inf }
 0xa87   :  { %1702 = vmax.xlane.f32.xlu2 %v1701_v2 }
 0xa8c   :  { %1732 = vadd.xlane.f32.xlu0 %v1731_v46  ;;  %1729 = vadd.xlane.f32.xlu1 %v1728_v6 }
 0xade   :  { %v1694_v35 = vpop.xlane.xlu2 %1693 }
 0xadf   :  { %v1708_v7 = vsub.f32 %v1606_v49, %v1694_v35 }
 0xae1   :  { %v1720_v9 = vmul.f32 1.442695, %v1708_v7 }
 0xae3   :  { %2781 = vpow2.f32 %v1720_v9  ;;  %v1691_v11 = vpop.xlane.xlu0 %1690 }
 0xae4   :  { %v1707_v12 = vsub.f32 %v1582_v24, %v1691_v11 }
 0xae6   :  { %v1718_v34 = vmul.f32 1.442695, %v1707_v12 }
 0xae8   :  { %2783 = vpow2.f32 %v1718_v34 }
 0xae9   :  { %v3720_v13 = vpop.eup %2781 }
 0xaea   :  { %v1740_v14 = vsel %vm566_vm8, %v3720_v13, 0.0 }
 0xaeb   :  { %1741 = vadd.xlane.f32.xlu0 %v1740_v14 }
 0xaee   :  { %v2784_v16 = vpop.eup %2783 }
 0xaef   :  { %v1688_v17 = vpop.xlane.xlu1 %1687  ;;  %v1737_v19 = vsel %vm566_vm8, %v2784_v16, 0.0 }
 0xaf0   :  { %v1706_v20 = vsub.f32 %v1558_v58, %v1688_v17  ;;  %1738 = vadd.xlane.f32.xlu1 %v1737_v19 }
 0xaf2   :  { %v1716_v22 = vmul.f32 1.442695, %v1706_v20 }
 0xaf4   :  { %2785 = vpow2.f32 %v1716_v22 }
 0xaf7   :  { %v1697_v23 = vpop.xlane.xlu1 %1696  ;;  %v1700_v25 = vpop.xlane.xlu0 %1699 }
 0xaf8   :  { %v1709_v26 = vsub.f32 %v1630_v62, %v1697_v23  ;;  %v1710_v29 = vsub.f32 %v1654_v44, %v1700_v25  ;;  %v2606_v25 = vld [vmem:[#allocation11 + $0x18] sm:$0xff] }
 0xafa   :  { %v2786_v30 = vpop.eup %2785  ;;  %v1722_v31 = vmul.f32 1.442695, %v1709_v26  ;;  %v1724_v32 = vmul.f32 1.442695, %v1710_v29  ;;  %v1703_v36 = vpop.xlane.xlu2 %1702  ;;  %v2605_v26 = vld [vmem:[#allocation11 + $0x10] sm:$0xff] }
 0xafb   :  { %v1711_v37 = vsub.f32 %v1678_v28, %v1703_v36  ;;  %v1734_v38 = vsel %vm566_vm8, %v2786_v30, 0.0 }
 0xafc   :  { %2787 = vpow2.f32 %v1722_v31  ;;  %1735 = vadd.xlane.f32.xlu2 %v1734_v38 }
 0xafd   :  { %2789 = vpow2.f32 %v1724_v32  ;;  %v1726_v39 = vmul.f32 1.442695, %v1711_v37 }
 0xaff   :  { %2791 = vpow2.f32 %v1726_v39  ;;  %v1730_v40 = vpop.xlane.xlu1 %1729  ;;  %v1733_v41 = vpop.xlane.xlu0 %1732 }
 0xb00   :  { %2793 = vrcp.f32 %v1730_v40 }
 0xb01   :  { %2795 = vrcp.f32 %v1733_v41 }
 0xb02   :  { %v2788_v42 = vpop.eup %2787 }
 0xb03   :  { %v2790_v43 = vpop.eup %2789  ;;  %v1743_v45 = vsel %vm566_vm8, %v2788_v42, 0.0 }
 0xb04   :  { %1744 = vadd.xlane.f32.xlu2 %v1743_v45  ;;  %v1746_v18 = vsel %vm566_vm8, %v2790_v43, 0.0 }
 0xb05   :  { %v2792_v47 = vpop.eup %2791  ;;  %1747 = vadd.xlane.f32.xlu1 %v1746_v18 }
 0xb06   :  { %v2794_v48 = vpop.eup %2793  ;;  %v1749_v49 = vsel %vm566_vm8, %v2792_v47, 0.0 }
 0xb07   :  { %v2796_v50 = vpop.eup %2795  ;;  %v1760_v51 = vmul.f32 %v2794_v48, %v2778_v4  ;;  %1750 = vadd.xlane.f32.xlu0 %v1749_v49  ;;  %v2718_v49 = vld [vmem:[#allocation13 + $0x1] ss:$0 sm:$0xff] }
 0xb08   :  { %v1761_v24 = vmul.f32 %v2796_v50, %v2780_v5 }
 0xb09   :  { %2516 = vmatmul.msk.f32.vlgmr.msrb.gmra.mxu2 %vm566_vm8, %v1760_v51 }
 0xb0a   :  { %2517 = vmatmul.msk.f32.vlgmr.msra.gmra.mxu3 %vm566_vm8, %v1761_v24 }
 0xb1b   :  { %2676 = vrot.lane.b32.xlu0 %v2675_v52, %s3275_s27 }
 0xb1c   :  { %2666 = vrot.lane.b32.xlu2 %v2675_v52, %s3274_s13 }
 0xb1e   :  { %2671 = vrot.lane.b32.xlu1 %v2675_v52, %s3276_s26 }
 0xb5e   :  { %v1742_v57 = vpop.xlane.xlu0 %1741 }
 0xb63   :  { %v1739_v56 = vpop.xlane.xlu1 %1738 }
 0xb64   :  { %2797 = vrcp.f32 %v1739_v56 }
 0xb6a   :  { %v2798_v58 = vpop.eup %2797 }
 0xb6b   :  { %v1763_v8 = vmul.f32 %v2798_v58, %v2784_v16 }
 0xb6f   :  { %v1736_v55 = vpop.xlane.xlu2 %1735 }
 0xb70   :  { %2799 = vrcp.f32 %v1736_v55 }
 0xb76   :  { %v2800_v59 = vpop.eup %2799 }
 0xb77   :  { %v1745_v15 = vpop.xlane.xlu2 %1744  ;;  %v1762_v62 = vmul.f32 %v2800_v59, %v2786_v30 }
 0xb78   :  { %v1748_v21 = vpop.xlane.xlu1 %1747 }
 0xb79   :  { %2801 = vrcp.f32 %v1748_v21 }
 0xb7a   :  { %v1751_v27 = vpop.xlane.xlu0 %1750 }
 0xb7b   :  { %2803 = vrcp.f32 %v1751_v27 }
 0xb7c   :  { %2805 = vrcp.f32 %v1742_v57 }
 0xb7d   :  { %2807 = vrcp.f32 %v1745_v15 }
 0xb7f   :  { %v2667_v60 = vpop.permute.xlu2 %2666  ;;  %v2802_v63 = vpop.eup %2801 }
 0xb80   :  { %v2669_v61 = vunpack.i.h.bf16 %v2667_v60  ;;  %v2668_v33 = vunpack.i.l.bf16 %v2667_v60  ;;  %v1766_v4 = vmul.f32 %v2802_v63, %v2790_v43 }
 0xb81   :  { %v2804_v44 = vpop.eup %2803 }
 0xb82   :  { %1832 = vmatpush.msra.mxu0 %v2668_v33  ;;  %1855 = vmatpush.msra.mxu1 %v2669_v61  ;;  %v2806_v0 = vpop.eup %2805  ;;  %v1767_v5 = vmul.f32 %v2804_v44, %v2792_v47 }
 0xb83   :  { %2518 = vmatmul.msk.f32.vlgmr.msra.gmra.mxu0 %vm566_vm8, %v1762_v62  ;;  %2519 = vmatmul.msk.f32.vlgmr.msra.gmra.mxu1 %vm566_vm8, %v1763_v8  ;;  %v2808_v2 = vpop.eup %2807  ;;  %v1764_v7 = vmul.f32 %v2806_v0, %v3720_v13  ;;  %v2607_v0 = vld [vmem:[#allocation17 + $0x10] sm:$0xff] }
 0xb84   :  { %v1765_v9 = vmul.f32 %v2808_v2, %v2788_v42 }
 0xb8c   :  { %v1788_v17 = vpop.f32.mrf.mxu2 }
 0xb8d   :  { %v2677_v53 = vpop.permute.xlu0 %2676  ;;  %v1811_v19 = vpop.f32.mrf.mxu3 }
 0xb8e   :  { %v2679_v1 = vunpack.i.h.bf16 %v2677_v53  ;;  %v2678_v28 = vunpack.i.l.bf16 %v2677_v53 }
 0xb90   :  { %v2672_v46 = vpop.permute.xlu1 %2671  ;;  %1924 = vmatpush.msrb.mxu0 %v2678_v28  ;;  %1947 = vmatpush.msrb.mxu1 %v2679_v1 }
 0xb91   :  { %v2674_v6 = vunpack.i.h.bf16 %v2672_v46  ;;  %v2673_v35 = vunpack.i.l.bf16 %v2672_v46  ;;  %2522 = vmatmul.msk.f32.vlgmr.msrb.gmra.mxu0 %vm566_vm8, %v1766_v4  ;;  %2523 = vmatmul.msk.f32.vlgmr.msrb.gmra.mxu1 %vm566_vm8, %v1767_v5 }
 0xb93   :  { %1878 = vmatpush.msra.mxu2 %v2673_v35  ;;  %1901 = vmatpush.msrb.mxu3 %v2674_v6 }
 0xb94   :  { %2520 = vmatmul.msk.f32.vlgmr.msra.gmra.mxu2 %vm566_vm8, %v1764_v7  ;;  %2521 = vmatmul.msk.f32.vlgmr.msrb.gmra.mxu3 %vm566_vm8, %v1765_v9 }
 0xb95   :  { %2014 = vmatpush.bf16.msrb.mxu2 %v2606_v25 }
 0xb99   :  { %2015 = vmatpush.bf16.msrb.mxu2 %v2605_v26 }
 0xc00   :  { %v1834_v11 = vpop.f32.mrf.mxu0  ;;  %v1857_v12 = vpop.f32.mrf.mxu1 }
 0xc01   :  { %v2680_v34 = vpack.i.bf16 %v1857_v12, %v1834_v11 }
 0xc03   :  { %2681 = vrot.lane.b32.xlu2 %v2680_v34, %s3264_s0 }
 0xc0e   :  { %v1926_v14 = vpop.f32.mrf.mxu0  ;;  %v1949_v16 = vpop.f32.mrf.mxu1 }
 0xc0f   :  { %v2690_v20 = vpack.i.bf16 %v1949_v16, %v1926_v14 }
 0xc11   :  { %2691 = vrot.lane.b32.xlu1 %v2690_v20, %s3277_s11 }
 0xc17   :  { %v1880_v13 = vpop.f32.mrf.mxu2  ;;  %v1903_v22 = vpop.f32.mrf.mxu3 }
 0xc18   :  { %v2685_v23 = vpack.i.bf16 %v1903_v22, %v1880_v13  ;;  %v2720_v22 = vld [vmem:[#allocation16 + $0x1] ss:$0 sm:$0xff] }
 0xc1a   :  { %2686 = vrot.lane.b32.xlu0 %v2685_v23, %s3252_s4 }
 0xc5d   :  { %v2682_v29 = vpop.permute.xlu2 %2681 }
 0xc5e   :  { %v2684_v30 = vunpack.i.h.bf16 %v2682_v29  ;;  %v2683_v31 = vunpack.i.l.bf16 %v2682_v29 }
 0xc60   :  { %v1976_v39 = vsel %vm566_vm8, %v1788_v17, %v2683_v31  ;;  %v1977_v40 = vsel %vm566_vm8, %v1811_v19, %v2684_v30  ;;  %v2719_v17 = vld [vmem:[#allocation14 + $0x1] ss:$0 sm:$0xff] }
 0xc83   :  { %v2692_v32 = vpop.permute.xlu1 %2691 }
 0xc84   :  { %v2694_v41 = vunpack.i.h.bf16 %v2692_v32  ;;  %v2693_v42 = vunpack.i.l.bf16 %v2692_v32  ;;  %v2612_v32 = vld [vmem:[%s3811_s12 + $0x38] sm:$0xff] }
 0xc85   :  { %2186 = vmatpush.bf16.msra.mxu0 %v2612_v32 }
 0xc8c   :  { %v2687_v36 = vpop.permute.xlu0 %2686 }
 0xc8d   :  { %v2689_v37 = vunpack.i.h.bf16 %v2687_v36  ;;  %v2688_v38 = vunpack.i.l.bf16 %v2687_v36  ;;  %v2611_v36 = vld [vmem:[%s3811_s12 + $0x30] sm:$0xff] }
 0xc8e   :  { %2187 = vmatpush.bf16.msra.mxu0 %v2611_v36 }
 0xc8f   :  { %v1979_v43 = vsel %vm1057_vm9, %v1977_v40, %v2689_v37  ;;  %v1978_v45 = vsel %vm1057_vm9, %v1976_v39, %v2688_v38  ;;  %v2610_v37 = vld [vmem:[%s3811_s12 + $0x28] sm:$0xff]  ;;  %v2609_v40 = vld [vmem:[%s3811_s12 + $0x20] sm:$0xff] }
 0xc90   :  { %v1980_v18 = vsel %vm1060_vm10, %v1978_v45, %v2693_v42  ;;  %v1981_v47 = vsel %vm1060_vm10, %v1979_v43, %v2694_v41  ;;  %v2721_v38 = vld [vmem:[#allocation19 + $0x1] ss:$0 sm:$0xff] }
 0xc91   :  { %v1989_v48 = vpack.c.bf16 %v1981_v47, %v1980_v18 }
 0xc92   :  { %2188 = vmatpush.bf16.msra.mxu0 %v2610_v37 }
 0xc93   :  { %2532 = vmatmul.msk.bf16.vlgmr.msrb.gmra.mxu2 %vm322_vm0, %v1989_v48 }
 0xc96   :  { %2189 = vmatpush.bf16.msra.mxu0 %v2609_v40 }
 0xd16   :  { %v2017_v50 = vpop.f32.mrf.mxu2 }
 0xd17   :  { %v2018_v51 = vadd.f32 %v2718_v49, %v2017_v50 }
 0xd19   :  { %v2022_v24 = vadd.f32 %v2018_v51, %v3659_v54 }
 0xd1b   :  { %v2028_v52 = vsel %vm322_vm0, %v2022_v24, 0.0 }
 0xd1c   :  { %2029 = vadd.xlane.f32.xlu2 %v2028_v52 }
 0xd1e   :  { %v2019_v55 = vpop.f32.mrf.mxu2 }
 0xd1f   :  { %v2020_v56 = vadd.f32 %v2718_v49, %v2019_v55 }
 0xd21   :  { %v2023_v15 = vadd.f32 %v2020_v56, %v3661_v3  ;;  %v2608_v3 = vld [vmem:[#allocation17 + $0x18] sm:$0xff] }
 0xd22   :  { %2114 = vmatpush.bf16.msra.mxu3 %v2608_v3 }
 0xd23   :  { %v2031_v57 = vsel %vm322_vm0, %v2023_v15, 0.0 }
 0xd24   :  { %2032 = vadd.xlane.f32.xlu0 %v2031_v57 }
 0xd26   :  { %2115 = vmatpush.bf16.msra.mxu3 %v2607_v0 }
 0xd8f   :  { %v2030_v58 = vpop.xlane.xlu2 %2029 }
 0xd90   :  { %v2034_v59 = vmul.f32 %v2030_v58, %v3471_v10 }
 0xd92   :  { %v2036_v60 = vsub.f32 %v2022_v24, %v2034_v59 }
 0xd94   :  { %v2038_v61 = vmul.f32 %v2036_v60, %v2036_v60 }
 0xd96   :  { %v2040_v33 = vsel %vm322_vm0, %v2038_v61, 0.0 }
 0xd97   :  { %v2033_v8 = vpop.xlane.xlu0 %2032  ;;  %2041 = vadd.xlane.f32.xlu1 %v2040_v33 }
 0xd98   :  { %v2035_v54 = vmul.f32 %v2033_v8, %v3471_v10 }
 0xd9a   :  { %v2037_v62 = vsub.f32 %v2023_v15, %v2035_v54  ;;  %v2722_v54 = vld [vmem:[#allocation20 + $0x1] ss:$0 sm:$0xff] }
 0xd9c   :  { %v2039_v21 = vmul.f32 %v2037_v62, %v2037_v62 }
 0xd9e   :  { %v2043_v27 = vsel %vm322_vm0, %v2039_v21, 0.0 }
 0xd9f   :  { %2044 = vadd.xlane.f32.xlu2 %v2043_v27 }
 0xe0a   :  { %v2042_v63 = vpop.xlane.xlu1 %2041 }
 0xe0b   :  { %v2046_v44 = vmul.f32 %v2042_v63, %v3471_v10 }
 0xe0d   :  { %v2048_v53 = vadd.f32 1e-12, %v2046_v44 }
 0xe0f   :  { %2809 = vrsqrt.f32 %v2048_v53  ;;  %vm2056_vm9 = vweird.f32 %v2048_v53 }
 0xe12   :  { %v2045_v1 = vpop.xlane.xlu2 %2044 }
 0xe13   :  { %v2047_v28 = vmul.f32 %v2045_v1, %v3471_v10 }
 0xe15   :  { %v2810_v2 = vpop.eup %2809  ;;  %v2049_v4 = vadd.f32 1e-12, %v2047_v28 }
 0xe16   :  { %v2051_v5 = vmul.f32 %v2810_v2, %v2048_v53  ;;  %vm2057_vm8 = vweird.f32 %v2810_v2 }
 0xe17   :  { %2811 = vrsqrt.f32 %v2049_v4  ;;  %vm2058_vm10 = vmor %vm2056_vm9, %vm2057_vm8  ;;  %vm2066_vm13 = vweird.f32 %v2049_v4 }
 0xe18   :  { %v2052_v46 = vmul.f32 %v2810_v2, %v2051_v5 }
 0xe1a   :  { %v2053_v6 = vmul.f32 0.5, %v2052_v46 }
 0xe1c   :  { %v2054_v35 = vsub.f32 1.5, %v2053_v6 }
 0xe1d   :  { %v2812_v7 = vpop.eup %2811 }
 0xe1e   :  { %v2055_v9 = vmul.f32 %v2810_v2, %v2054_v35  ;;  %v2061_v11 = vmul.f32 %v2812_v7, %v2049_v4  ;;  %vm2067_vm12 = vweird.f32 %v2812_v7 }
 0xe1f   :  { %vm2068_vm14 = vmor %vm2066_vm13, %vm2067_vm12 }
 0xe20   :  { %v2062_v12 = vmul.f32 %v2812_v7, %v2061_v11  ;;  %v2059_v34 = vsel %vm2058_vm10, %v2810_v2, %v2055_v9 }
 0xe21   :  { %v2070_v19 = vmul.f32 %v2059_v34, %v2036_v60 }
 0xe22   :  { %v2063_v14 = vmul.f32 0.5, %v2062_v12 }
 0xe23   :  { %v2075_v23 = vmul.f32 %v2719_v17, %v2070_v19  ;;  %v2613_v19 = vld [vmem:[#allocation25] sm:$0xff] }
 0xe24   :  { %v2064_v16 = vsub.f32 1.5, %v2063_v14  ;;  %v2614_v14 = vld [vmem:[#allocation25 + $0x8] sm:$0xff] }
 0xe25   :  { %v2080_v29 = vadd.f32 %v2720_v22, %v2075_v23  ;;  %2295 = vmatpush.bf16.msra.mxu1 %v2614_v14 }
 0xe26   :  { %v2065_v20 = vmul.f32 %v2812_v7, %v2064_v16 }
 0xe28   :  { %v2069_v13 = vsel %vm2068_vm14, %v2812_v7, %v2065_v20 }
 0xe29   :  { %v2071_v25 = vmul.f32 %v2069_v13, %v2037_v62  ;;  %2296 = vmatpush.bf16.msra.mxu1 %v2613_v19 }
 0xe2b   :  { %v2076_v26 = vmul.f32 %v2719_v17, %v2071_v25 }
 0xe2d   :  { %v2081_v30 = vadd.f32 %v2720_v22, %v2076_v26 }
 0xe2f   :  { %v2089_v31 = vpack.c.bf16 %v2081_v30, %v2080_v29 }
 0xe31   :  { %2541 = vmatmul.msk.bf16.vlgmr.msra.gmra.mxu3 %vm322_vm0, %v2089_v31 }
 0xeb4   :  { %v2117_v39 = vpop.f32.mrf.mxu3 }
 0xeb5   :  { %v2118_v41 = vadd.f32 %v2721_v38, %v2117_v39 }
 0xeb7   :  { %v2122_v42 = vmul.f32 %v2118_v41, %v2118_v41 }
 0xeb9   :  { %v2124_v43 = vmul.f32 %v2122_v42, %v2118_v41 }
 0xebb   :  { %v2126_v45 = vmul.f32 0.044715, %v2124_v43 }
 0xebc   :  { %v2119_v18 = vpop.f32.mrf.mxu3 }
 0xebd   :  { %v2128_v47 = vadd.f32 %v2126_v45, %v2118_v41  ;;  %v2120_v48 = vadd.f32 %v2721_v38, %v2119_v18  ;;  %v2723_v38 = vld [vmem:[#allocation22 + $0x1] ss:$0 sm:$0xff] }
 0xebf   :  { %v2130_v49 = vmul.f32 0.7978846, %v2128_v47  ;;  %v2123_v50 = vmul.f32 %v2120_v48, %v2120_v48 }
 0xec1   :  { %v2125_v51 = vmul.f32 %v2123_v50, %v2120_v48  ;;  %2813 = vtanh.f32 %v2130_v49 }
 0xec3   :  { %v2127_v24 = vmul.f32 0.044715, %v2125_v51 }
 0xec5   :  { %v2129_v52 = vadd.f32 %v2127_v24, %v2120_v48 }
 0xec7   :  { %v2131_v55 = vmul.f32 0.7978846, %v2129_v52  ;;  %v2814_v56 = vpop.eup %2813 }
 0xec8   :  { %v2134_v15 = vadd.f32 1.0, %v2814_v56 }
 0xec9   :  { %2815 = vtanh.f32 %v2131_v55 }
 0xeca   :  { %v2136_v58 = vmul.f32 0.5, %v2134_v15  ;;  %v2616_v15 = vld [vmem:[%s3817_s18 + $0x8] sm:$0xff] }
 0xecb   :  { %2333 = vmatpush.bf16.msra.mxu2 %v2616_v15 }
 0xecc   :  { %v2138_v61 = vmul.f32 %v2136_v58, %v2118_v41  ;;  %v2724_v41 = vld [vmem:[#allocation23 + $0x1] ss:$0 sm:$0xff]  ;;  %v2725_v58 = vld [vmem:[#allocation26] ss:$0 sm:$0xff] }
 0xecf   :  { %v2816_v57 = vpop.eup %2815 }
 0xed0   :  { %v2135_v59 = vadd.f32 1.0, %v2816_v57  ;;  %v2615_v57 = vld [vmem:[%s3817_s18] sm:$0xff]  ;;  %s2349_s18 = sshll.u32 %s3834_s16, 4  ;;  %s2350_s18 = int_to_ptr.hbm [resolvable:$true] %s2349_s18 }
 0xed1   :  { %2334 = vmatpush.bf16.msra.mxu2 %v2615_v57 }
 0xed2   :  { %v2137_v60 = vmul.f32 0.5, %v2135_v59 }
 0xed4   :  { %v2139_v33 = vmul.f32 %v2137_v60, %v2120_v48 }
 0xed6   :  { %v2151_v8 = vpack.c.bf16 %v2139_v33, %v2138_v61 }
 0xed8   :  { %2566 = vmatmul.msk.bf16.vlgmr.msra.gmra.mxu0 %vm1252_vm2, %v2151_v8 }
 0xf55   :  { %v2191_v62 = vpop.f32.mrf.mxu0 }
 0xf56   :  { %v2192_v21 = vadd.f32 %v2722_v54, %v2191_v62 }
 0xf58   :  { %v2196_v27 = vadd.f32 %v2192_v21, %v2080_v29 }
 0xf5a   :  { %v2202_v3 = vsel %vm322_vm0, %v2196_v27, 0.0 }
 0xf5b   :  { %2203 = vadd.xlane.f32.xlu1 %v2202_v3 }
 0xf5d   :  { %v2193_v63 = vpop.f32.mrf.mxu0 }
 0xf5e   :  { %v2194_v44 = vadd.f32 %v2722_v54, %v2193_v63  ;;  %v2726_v54 = vld [vmem:[%s3833_s25] ss:$0 sm:$0xff] }
 0xf60   :  { %v2197_v53 = vadd.f32 %v2194_v44, %v2081_v30 }
 0xf62   :  { %v2205_v0 = vsel %vm322_vm0, %v2197_v53, 0.0 }
 0xf63   :  { %2206 = vadd.xlane.f32.xlu0 %v2205_v0 }
 0xfce   :  { %v2204_v1 = vpop.xlane.xlu1 %2203 }
 0xfcf   :  { %v2208_v28 = vmul.f32 %v2204_v1, %v3471_v10 }
 0xfd1   :  { %v2210_v2 = vsub.f32 %v2196_v27, %v2208_v28 }
 0xfd3   :  { %v2212_v4 = vmul.f32 %v2210_v2, %v2210_v2 }
 0xfd5   :  { %v2214_v5 = vsel %vm322_vm0, %v2212_v4, 0.0 }
 0xfd6   :  { %v2207_v46 = vpop.xlane.xlu0 %2206  ;;  %2215 = vadd.xlane.f32.xlu0 %v2214_v5 }
 0xfd7   :  { %v2209_v6 = vmul.f32 %v2207_v46, %v3471_v10 }
 0xfd9   :  { %v2211_v35 = vsub.f32 %v2197_v53, %v2209_v6 }
 0xfdb   :  { %v2213_v7 = vmul.f32 %v2211_v35, %v2211_v35 }
 0xfdd   :  { %v2217_v9 = vsel %vm322_vm0, %v2213_v7, 0.0 }
 0xfde   :  { %2218 = vadd.xlane.f32.xlu2 %v2217_v9 }
0x1049   :  { %v2216_v11 = vpop.xlane.xlu0 %2215 }
0x104a   :  { %v2220_v12 = vmul.f32 %v2216_v11, %v3471_v10 }
0x104c   :  { %v2222_v34 = vadd.f32 1e-12, %v2220_v12 }
0x104e   :  { %2817 = vrsqrt.f32 %v2222_v34  ;;  %vm2230_vm1 = vweird.f32 %v2222_v34 }
0x1051   :  { %v2219_v16 = vpop.xlane.xlu2 %2218 }
0x1052   :  { %v2221_v17 = vmul.f32 %v2219_v16, %v3471_v10 }
0x1054   :  { %v2818_v20 = vpop.eup %2817  ;;  %v2223_v13 = vadd.f32 1e-12, %v2221_v17 }
0x1055   :  { %v2225_v22 = vmul.f32 %v2818_v20, %v2222_v34  ;;  %vm2231_vm15 = vweird.f32 %v2818_v20 }
0x1056   :  { %2819 = vrsqrt.f32 %v2223_v13  ;;  %vm2232_vm2 = vmor %vm2230_vm1, %vm2231_vm15  ;;  %vm2240_vm4 = vweird.f32 %v2223_v13 }
0x1057   :  { %v2226_v23 = vmul.f32 %v2818_v20, %v2225_v22 }
0x1059   :  { %v2227_v25 = vmul.f32 0.5, %v2226_v23 }
0x105b   :  { %v2228_v26 = vsub.f32 1.5, %v2227_v25 }
0x105c   :  { %v2820_v29 = vpop.eup %2819 }
0x105d   :  { %v2229_v30 = vmul.f32 %v2818_v20, %v2228_v26  ;;  %v2235_v31 = vmul.f32 %v2820_v29, %v2223_v13  ;;  %vm2241_vm3 = vweird.f32 %v2820_v29 }
0x105e   :  { %vm2242_vm5 = vmor %vm2240_vm4, %vm2241_vm3 }
0x105f   :  { %v2233_v32 = vsel %vm2232_vm2, %v2818_v20, %v2229_v30  ;;  %v2236_v36 = vmul.f32 %v2820_v29, %v2235_v31 }
0x1060   :  { %v2244_v10 = vmul.f32 %v2233_v32, %v2210_v2 }
0x1061   :  { %v2237_v37 = vmul.f32 0.5, %v2236_v36 }
0x1062   :  { %v2249_v42 = vmul.f32 %v2723_v38, %v2244_v10 }
0x1063   :  { %v2238_v39 = vsub.f32 1.5, %v2237_v37 }
0x1064   :  { %v2254_v18 = vadd.f32 %v2724_v41, %v2249_v42 }
0x1065   :  { %v2239_v40 = vmul.f32 %v2820_v29, %v2238_v39 }
0x1066   :  { %v2261_v49 = vpack.c.bf16 %v2254_v18, %v2254_v18 }
0x1067   :  { %v2243_v43 = vsel %vm2242_vm5, %v2820_v29, %v2239_v40 }
0x1068   :  { %v2245_v45 = vmul.f32 %v2243_v43, %v2211_v35  ;;  %v2268_v24 = vunpack.c.l.b16 %v2261_v49 }
0x106a   :  { %v2250_v47 = vmul.f32 %v2723_v38, %v2245_v45 }
0x106c   :  { %v2255_v48 = vadd.f32 %v2724_v41, %v2250_v47 }
0x106e   :  { %v2262_v50 = vpack.c.bf16 %v2255_v48, %v2255_v48 }
0x1070   :  { %v2269_v51 = vunpack.c.l.b16 %v2262_v50 }
0x1072   :  { %v2270_v52 = vrot.slane %v2269_v51, 7 }
0x1074   :  { %v2272_v55 = vsel %vm2271_vm6, %v2270_v52, %v2268_v24 }
0x1075   :  { %v2273_v56 = vpack.c.b16 %v2272_v55, %v2272_v55 }
0x1077   :  { %2575 = vmatmul.msk.bf16.vlgmr.msra.gmra.mxu1 %vm322_vm0, %v2273_v56 }
0x10f4   :  { %v2298_v59 = vpop.f32.mrf.mxu1 }
0x10f5   :  { %v2299_v60 = vadd.f32 %v2725_v58, %v2298_v59 }
0x10f7   :  { %2821 = vtanh.f32 %v2299_v60 }
0x10fc   :  { %v2300_v61 = vpop.f32.mrf.mxu1 }
0x10fd   :  { %v2822_v33 = vpop.eup %2821 }
0x10fe   :  { %v2308_v8 = vpack.c.bf16 %v2822_v33, %v2822_v33 }
0x1100   :  { %2584 = vmatmul.msk.bf16.vlgmr.msra.gmra.mxu2 %vm322_vm0, %v2308_v8 }
0x1183   :  { %v2336_v62 = vpop.f32.mrf.mxu2 }
0x1184   :  { %v2337_v21 = vadd.f32 %v2726_v54, %v2336_v62 }
0x1186   :  { %2341 = vst.msk [vmem:[#allocation28] sm:$0x3] %vm2340_vm7, %v2337_v21 }
0x1187   :  { %2352 = dma.vmem_to_hbm [thread:$0]  %s2348_s15, 32, %s2350_s18, [#allocation4]  }
0x118b   :  { %v2338_v27 = vpop.f32.mrf.mxu2 }
0x118c   :  { %3249 = dma.done.wait [#allocation4], 32  }
0x118d   :  { %3250 = vsyncadd [#allocation4], 4294967264 }
0x118e   :  { %2357 = vsyncpa [#allocation3], 1 }
0x118f   :  { %2358 = vsyncpa [#allocation6], 1 }
0x1190   :  { %2359 = vsyncpa [#allocation9], 1 }
0x1191   :  { %2360 = vsyncpa [#allocation12], 1 }
0x1192   :  { %2361 = vsyncpa [#allocation15], 1 }
0x1193   :  { %2362 = vsyncpa [#allocation18], 1 }
0x1194   :  { %2363 = vsyncpa [#allocation21], 1 }
0x1195   :  { %2364 = vsyncpa [#allocation24], 1 }
0x1196   :  { %2365 = vsyncpa [#allocation27], 1 }
0x1197   :  { %2366 = vsyncpa [#allocation4], 1 }

</bundles_post_ra>
